<compile_context>
chip_gen: v7x
topology: tpu7x:2x2x1
jax: 0.10.0
libtpu: 0.0.40
codegen_flags: <defaults>
</compile_context>

<pallas_src>
import functools

import jax
import jax.numpy as jnp
from jax.experimental import pallas as pl
from jax.experimental.pallas import tpu as pltpu

B = 2
T = 8                     # sequence length (timesteps)
C = 1
H = W = 64                # forced by the module: fc = Linear(64*64, num_classes)
IN_FEATURES = 64 * 64
NUM_CLASSES = 10


def _raw_cam_kernel(x_ref, w_ref, b_ref, out_ref, *, ts):
    """x_ref: (B, T, D) VMEM, w_ref: (D, NC), b_ref: (1, NC), out_ref: (B, NC)."""
    x = x_ref[...]                                                   # (B, T, D)
    # The module's loop starts at ii = 1, so timestep 0 never contributes.
    t_idx = jax.lax.broadcasted_iota(jnp.int32, x.shape, dimension=1)
    x = jnp.where(t_idx >= 1, x, 0.0)
    s = jnp.sum(x, axis=1)                                           # (B, D)
    acc = jnp.dot(s, w_ref[...], preferred_element_type=jnp.float32)  # (B, NC)
    # sum_t (frame_t @ W^T + b) == (sum_t frame_t) @ W^T + (T-1)*b ; then /T.
    out_ref[...] = (acc + (ts - 1.0) * b_ref[...]) * (1.0 / ts)


def raw_cam_downsampled_forward(x, fc_w, fc_b):
    """x: (B, T, C, H, W) or (B, C, H, W); fc_w: (NC, 4096) torch layout; fc_b: (NC,)."""
    if x.ndim < 5:
        x = x[:, None]                          # torch.unsqueeze(input, 1)
    b_z, ts = x.shape[0], x.shape[1]
    d = x.shape[2] * x.shape[3] * x.shape[4]
    assert d == IN_FEATURES, "module hard-codes Linear(64*64, num_classes)"
    nc = fc_w.shape[0]

    if ts < 2:
        # `for ii in range(1, ts)` never runs -> out = zeros / ts
        return jnp.zeros((b_z, nc), jnp.float32)

    z = x.reshape(b_z, ts, d).astype(jnp.float32)    # frame.view(B, -1) per timestep
    w_t = fc_w.T.astype(jnp.float32)                 # (D, NC) for row-major matmul
    bias = fc_b.reshape(1, nc).astype(jnp.float32)

    return pl.pallas_call(
        functools.partial(_raw_cam_kernel, ts=ts),
        out_shape=jax.ShapeDtypeStruct((b_z, nc), jnp.float32),
        in_specs=[pl.BlockSpec(memory_space=pltpu.MemorySpace.VMEM)] * 3,
        out_specs=pl.BlockSpec(memory_space=pltpu.MemorySpace.VMEM),
    )(z, w_t, bias)


def reference_forward(x, fc_w, fc_b):
    """Pure-JAX line-by-line transcription of the PyTorch forward."""
    if x.ndim < 5:
        x = x[:, None]
    b_z, ts = x.shape[0], x.shape[1]
    out = jnp.zeros((b_z, fc_w.shape[0]), jnp.float32)
    for ii in range(1, ts):
        frame = x[:, ii].reshape(b_z, -1)
        out = out + frame @ fc_w.T + fc_b
    return out / ts


if __name__ == "__main__":
    key = jax.random.PRNGKey(0)
    kx, kw, kb = jax.random.split(key, 3)

    # (B, T, C, H, W); C*H*W = 4096 is forced by the module's fc in_features.
    x = jax.random.normal(kx, (B, T, C, H, W), dtype=jnp.float32)
    fc_w = jax.random.normal(kw, (NUM_CLASSES, IN_FEATURES), jnp.float32) / jnp.sqrt(
        float(IN_FEATURES))
    fc_b = jax.random.normal(kb, (NUM_CLASSES,), jnp.float32) * 0.05

    out = jax.block_until_ready(raw_cam_downsampled_forward(x, fc_w, fc_b))
    ref = jax.block_until_ready(reference_forward(x, fc_w, fc_b))

    assert out.shape == (B, NUM_CLASSES)
    assert jnp.allclose(out, ref, rtol=1e-3, atol=1e-3), (out, ref)
    print("KERNEL_OK")
</pallas_src>

<mosaic_0001>
module attributes {stable_mosaic.version = 11 : i64} {
  func.func @_raw_cam_kernel(%arg0: memref<2x8x4096xf32, #tpu.memory_space<vmem>>, %arg1: memref<4096x10xf32, #tpu.memory_space<vmem>>, %arg2: memref<1x10xf32, #tpu.memory_space<vmem>>, %arg3: memref<2x10xf32, #tpu.memory_space<vmem>>) attributes {dimension_semantics = [], scalar_prefetch = 0 : i64, scratch_operands = 0 : i64, tpu.core_type = #tpu.core_type<tc>} {
    %c0 = arith.constant 0 : index
    %c0_0 = arith.constant 0 : index
    %c0_1 = arith.constant 0 : index
    %0 = vector.load %arg0[%c0, %c0_0, %c0_1] : memref<2x8x4096xf32, #tpu.memory_space<vmem>>, vector<2x8x4096xf32>
    %1 = tpu.iota {dimensions = array<i32: 1>} : vector<2x8x4096xi32>
    %c1_i32 = arith.constant 1 : i32
    %2 = vector.broadcast %c1_i32 : i32 to vector<2x8x4096xi32>
    %3 = arith.cmpi sge, %1, %2 : vector<2x8x4096xi32>
    %cst = arith.constant 0.000000e+00 : f32
    %4 = vector.broadcast %cst : f32 to vector<2x8x4096xf32>
    %5 = arith.select %3, %0, %4 : vector<2x8x4096xi1>, vector<2x8x4096xf32>
    %cst_2 = arith.constant dense<0.000000e+00> : vector<2x4096xf32>
    %6 = vector.multi_reduction <add>, %5, %cst_2 [1] : vector<2x8x4096xf32> to vector<2x4096xf32>
    %c0_3 = arith.constant 0 : index
    %c0_4 = arith.constant 0 : index
    %7 = vector.load %arg1[%c0_3, %c0_4] : memref<4096x10xf32, #tpu.memory_space<vmem>>, vector<4096x10xf32>
    %cst_5 = arith.constant dense<0.000000e+00> : vector<2x10xf32>
    %8 = tpu.matmul %6, %7, %cst_5 {dimension_numbers = #tpu.dot_dimension_numbers<[1], [0], [0], [1], [0, 0, 1, 1], [], []>} : vector<2x4096xf32>, vector<4096x10xf32>, vector<2x10xf32> -> vector<2x10xf32>
    %c0_6 = arith.constant 0 : index
    %c0_7 = arith.constant 0 : index
    %9 = vector.load %arg2[%c0_6, %c0_7] : memref<1x10xf32, #tpu.memory_space<vmem>>, vector<1x10xf32>
    %cst_8 = arith.constant 7.000000e+00 : f32
    %10 = vector.broadcast %cst_8 : f32 to vector<1x10xf32>
    %11 = arith.mulf %10, %9 : vector<1x10xf32>
    %12 = vector.broadcast %11 : vector<1x10xf32> to vector<2x10xf32>
    %13 = arith.addf %8, %12 : vector<2x10xf32>
    %cst_9 = arith.constant 1.250000e-01 : f32
    %14 = vector.broadcast %cst_9 : f32 to vector<2x10xf32>
    %15 = arith.mulf %13, %14 : vector<2x10xf32>
    %c0_10 = arith.constant 0 : index
    %c0_11 = arith.constant 0 : index
    %16 = vector.load %arg3[%c0_10, %c0_11] : memref<2x10xf32, #tpu.memory_space<vmem>>, vector<2x10xf32>
    tpu.vector_store %arg3[%c0_10, %c0_11], %15 {strides = array<i32>} : memref<2x10xf32, #tpu.memory_space<vmem>>, vector<2x10xf32>,
    return
  }
}

</mosaic_0001>

<bundles_post_ra>
// kernel: tpu_custom_call.1
= control target key start
LH: loop header
LB: loop body
LE: loop exit
PB: predicated region body
PF: predicated region fallthrough
CT: control target
= control target key end

     0   :  { %v79_v50 = vlaneseq  ;;  %vm1114_vm1 = vcmask 1041409   ;;  %s5581_s0 = inlined_call_operand.vmem [shape: f32[2,8,4096], index: 0, kind: input, shape index: {}]   ;;  %s5582_s1 = inlined_call_operand.vmem [shape: f32[4096,10], index: 1, kind: input, shape index: {}]   ;;  %s5583_s2 = inlined_call_operand.vmem [shape: f32[1,10], index: 2, kind: input, shape index: {}]   ;;  %s5584_s3 = inlined_call_operand.hbm [shape: f32[2,10], index: 3, kind: output, shape index: {}]  }
   0x1   :  { %v546_v0 = vld [vmem:[%s5582_s1 + $0x80] sm:$0xff]  ;;  %v547_v1 = vld [vmem:[%s5582_s1 + $0x88] sm:$0xff]  ;;  %v548_v11 = vld [vmem:[%s5582_s1 + $0x90] sm:$0xff] }
   0x2   :  { %v530_v2 = vld [vmem:[%s5582_s1] sm:$0xff]  ;;  %v2876_v3 = vpack.c.bf16 %v547_v1, %v546_v0  ;;  %v531_v4 = vld [vmem:[%s5582_s1 + $0x8] sm:$0xff]  ;;  %v549_v13 = vld [vmem:[%s5582_s1 + $0x98] sm:$0xff] }
   0x3   :  { %v578_v5 = vld [vmem:[%s5582_s1 + $0x180] sm:$0xff]  ;;  %v579_v6 = vld [vmem:[%s5582_s1 + $0x188] sm:$0xff]  ;;  %v2878_v7 = vpack.c.bf16 %v531_v4, %v530_v2  ;;  %v532_v14 = vld [vmem:[%s5582_s1 + $0x10] sm:$0xff]  ;;  %v2880_v16 = vpack.c.bf16 %v549_v13, %v548_v11 }
   0x4   :  { %v2908_v8 = vpack.c.bf16 %v579_v6, %v578_v5  ;;  %v562_v9 = vld [vmem:[%s5582_s1 + $0x100] sm:$0xff]  ;;  %v563_v10 = vld [vmem:[%s5582_s1 + $0x108] sm:$0xff]  ;;  %2877 = vmatprep.subr.bf16.mxu0 %v2876_v3  ;;  %v533_v15 = vld [vmem:[%s5582_s1 + $0x18] sm:$0xff]  ;;  %v3582_v3 = vshrl.u32 %v79_v50, 7 }
   0x5   :  { %v2910_v12 = vpack.c.bf16 %v563_v10, %v562_v9  ;;  %2879 = vmatpush3.bf16.msra.mxu0 %v2878_v7  ;;  %v2882_v17 = vpack.c.bf16 %v533_v15, %v532_v14  ;;  %v580_v18 = vld [vmem:[%s5582_s1 + $0x190] sm:$0xff]  ;;  %v581_v19 = vld [vmem:[%s5582_s1 + $0x198] sm:$0xff]  ;;  %v550_v23 = vld [vmem:[%s5582_s1 + $0xa0] sm:$0xff] }
   0x6   :  { %2909 = vmatprep.subr.bf16.mxu1 %v2908_v8  ;;  %v564_v20 = vld [vmem:[%s5582_s1 + $0x110] sm:$0xff]  ;;  %v2912_v21 = vpack.c.bf16 %v581_v19, %v580_v18  ;;  %v565_v22 = vld [vmem:[%s5582_s1 + $0x118] sm:$0xff]  ;;  %v551_v24 = vld [vmem:[%s5582_s1 + $0xa8] sm:$0xff]  ;;  %2881 = vmatprep.subr.bf16.mxu0 %v2880_v16  ;;  %vm81_vm0 = vcmp.ge.s32.totalorder %v3582_v3, 1 }
   0x7   :  { %2911 = vmatpush3.bf16.msra.mxu1 %v2910_v12  ;;  %v2914_v25 = vpack.c.bf16 %v565_v22, %v564_v20  ;;  %v2884_v26 = vpack.c.bf16 %v551_v24, %v550_v23  ;;  %v534_v27 = vld [vmem:[%s5582_s1 + $0x20] sm:$0xff]  ;;  %v535_v28 = vld [vmem:[%s5582_s1 + $0x28] sm:$0xff]  ;;  %v552_v35 = vld [vmem:[%s5582_s1 + $0xb0] sm:$0xff] }
   0x8   :  { %v582_v29 = vld [vmem:[%s5582_s1 + $0x1a0] sm:$0xff]  ;;  %2913 = vmatprep.subr.bf16.mxu1 %v2912_v21  ;;  %v583_v30 = vld [vmem:[%s5582_s1 + $0x1a8] sm:$0xff]  ;;  %v2886_v33 = vpack.c.bf16 %v535_v28, %v534_v27  ;;  %v553_v36 = vld [vmem:[%s5582_s1 + $0xb8] sm:$0xff] }
   0x9   :  { %v566_v31 = vld [vmem:[%s5582_s1 + $0x120] sm:$0xff]  ;;  %v567_v32 = vld [vmem:[%s5582_s1 + $0x128] sm:$0xff]  ;;  %2883 = vmatpush3.bf16.msra.mxu0 %v2882_v17  ;;  %v2916_v34 = vpack.c.bf16 %v583_v30, %v582_v29  ;;  %v536_v37 = vld [vmem:[%s5582_s1 + $0x30] sm:$0xff]  ;;  %v2888_v39 = vpack.c.bf16 %v553_v36, %v552_v35 }
   0xa   :  { %2885 = vmatprep.subr.bf16.mxu0 %v2884_v26  ;;  %v2918_v38 = vpack.c.bf16 %v567_v32, %v566_v31  ;;  %v537_v40 = vld [vmem:[%s5582_s1 + $0x38] sm:$0xff]  ;;  %v584_v41 = vld [vmem:[%s5582_s1 + $0x1b0] sm:$0xff]  ;;  %v554_v46 = vld [vmem:[%s5582_s1 + $0xc0] sm:$0xff] }
   0xb   :  { %2915 = vmatpush3.bf16.msra.mxu1 %v2914_v25  ;;  %v585_v42 = vld [vmem:[%s5582_s1 + $0x1b8] sm:$0xff]  ;;  %v568_v44 = vld [vmem:[%s5582_s1 + $0x130] sm:$0xff]  ;;  %v555_v47 = vld [vmem:[%s5582_s1 + $0xc8] sm:$0xff]  ;;  %v2890_v51 = vpack.c.bf16 %v537_v40, %v536_v37 }
   0xc   :  { %2917 = vmatprep.subr.bf16.mxu1 %v2916_v34  ;;  %v2920_v43 = vpack.c.bf16 %v585_v42, %v584_v41  ;;  %v569_v45 = vld [vmem:[%s5582_s1 + $0x138] sm:$0xff]  ;;  %v538_v48 = vld [vmem:[%s5582_s1 + $0x40] sm:$0xff]  ;;  %v539_v49 = vld [vmem:[%s5582_s1 + $0x48] sm:$0xff]  ;;  %v2892_v56 = vpack.c.bf16 %v555_v47, %v554_v46 }
   0xd   :  { %2887 = vmatpush3.bf16.msra.mxu0 %v2886_v33  ;;  %v586_v52 = vld [vmem:[%s5582_s1 + $0x1c0] sm:$0xff]  ;;  %v587_v53 = vld [vmem:[%s5582_s1 + $0x1c8] sm:$0xff]  ;;  %v2922_v55 = vpack.c.bf16 %v569_v45, %v568_v44  ;;  %v556_v58 = vld [vmem:[%s5582_s1 + $0xd0] sm:$0xff]  ;;  %v2894_v4 = vpack.c.bf16 %v539_v49, %v538_v48 }
   0xe   :  { %v570_v54 = vld [vmem:[%s5582_s1 + $0x140] sm:$0xff]  ;;  %2889 = vmatprep.subr.bf16.mxu0 %v2888_v39  ;;  %v571_v57 = vld [vmem:[%s5582_s1 + $0x148] sm:$0xff]  ;;  %v557_v59 = vld [vmem:[%s5582_s1 + $0xd8] sm:$0xff]  ;;  %v2924_v60 = vpack.c.bf16 %v587_v53, %v586_v52 }
   0xf   :  { %2919 = vmatpush3.bf16.msra.mxu1 %v2918_v38  ;;  %v540_v61 = vld [vmem:[%s5582_s1 + $0x50] sm:$0xff]  ;;  %v541_v62 = vld [vmem:[%s5582_s1 + $0x58] sm:$0xff]  ;;  %v558_v5 = vld [vmem:[%s5582_s1 + $0xe0] sm:$0xff]  ;;  %v2926_v8 = vpack.c.bf16 %v571_v57, %v570_v54  ;;  %v2896_v9 = vpack.c.bf16 %v557_v59, %v556_v58 }
  0x10   :  { %2921 = vmatprep.subr.bf16.mxu1 %v2920_v43  ;;  %v588_v63 = vld [vmem:[%s5582_s1 + $0x1d0] sm:$0xff]  ;;  %v589_v0 = vld [vmem:[%s5582_s1 + $0x1d8] sm:$0xff]  ;;  %v559_v6 = vld [vmem:[%s5582_s1 + $0xe8] sm:$0xff]  ;;  %v2898_v17 = vpack.c.bf16 %v541_v62, %v540_v61 }
  0x11   :  { %v3575_v1 = vld [vmem:[%s5582_s1 + $0x150] sm:$0xff]  ;;  %v3580_v2 = vld [vmem:[%s5582_s1 + $0x158] sm:$0xff]  ;;  %2891 = vmatpush3.bf16.msra.mxu0 %v2890_v51  ;;  %v3593_v7 = vld [vmem:[%s5582_s1 + $0x60] sm:$0xff]  ;;  %v2928_v13 = vpack.c.bf16 %v589_v0, %v588_v63  ;;  %v2900_v22 = vpack.c.bf16 %v559_v6, %v558_v5 }
  0x12   :  { %2893 = vmatprep.subr.bf16.mxu0 %v2892_v56  ;;  %v3598_v10 = vld [vmem:[%s5582_s1 + $0x68] sm:$0xff]  ;;  %v590_v11 = vld [vmem:[%s5582_s1 + $0x1e0] sm:$0xff]  ;;  %v3619_v16 = vld [vmem:[%s5582_s1 + $0xf0] sm:$0xff]  ;;  %v2930_v21 = vpack.c.bf16 %v3580_v2, %v3575_v1 }
  0x13   :  { %2923 = vmatpush3.bf16.msra.mxu1 %v2922_v55  ;;  %v591_v12 = vld [vmem:[%s5582_s1 + $0x1e8] sm:$0xff]  ;;  %v3609_v14 = vld [vmem:[%s5582_s1 + $0x160] sm:$0xff]  ;;  %v3624_v18 = vld [vmem:[%s5582_s1 + $0xf8] sm:$0xff]  ;;  %v2902_v23 = vpack.c.bf16 %v3598_v10, %v3593_v7 }
  0x14   :  { %2925 = vmatprep.subr.bf16.mxu1 %v2924_v60  ;;  %v3614_v15 = vld [vmem:[%s5582_s1 + $0x168] sm:$0xff]  ;;  %v3629_v19 = vld [vmem:[%s5582_s1 + $0x70] sm:$0xff]  ;;  %v3634_v20 = vld [vmem:[%s5582_s1 + $0x78] sm:$0xff]  ;;  %v2932_v24 = vpack.c.bf16 %v591_v12, %v590_v11  ;;  %v2904_v29 = vpack.c.bf16 %v3624_v18, %v3619_v16 }
  0x15   :  { %2895 = vmatpush3.bf16.msra.mxu0 %v2894_v4  ;;  %v3644_v25 = vld [vmem:[%s5582_s1 + $0x1f0] sm:$0xff]  ;;  %v3649_v26 = vld [vmem:[%s5582_s1 + $0x1f8] sm:$0xff]  ;;  %v2934_v28 = vpack.c.bf16 %v3614_v15, %v3609_v14  ;;  %v2906_v30 = vpack.c.bf16 %v3634_v20, %v3629_v19  ;;  %v16_v32 = vld [vmem:[%s5581_s0 + $0x8] sm:$0xff] }
  0x16   :  { %v3654_v27 = vld [vmem:[%s5582_s1 + $0x170] sm:$0xff]  ;;  %2897 = vmatprep.subr.bf16.mxu0 %v2896_v9  ;;  %v3665_v31 = vld [vmem:[%s5582_s1 + $0x178] sm:$0xff]  ;;  %v48_v33 = vld [vmem:[%s5581_s0 + $0x108] sm:$0xff]  ;;  %v2936_v34 = vpack.c.bf16 %v3649_v26, %v3644_v25  ;;  %v83_v36 = vsel %vm81_vm0, %v16_v32, 0.0 }
  0x17   :  { %2927 = vmatpush3.bf16.msra.mxu1 %v2926_v8  ;;  %v2938_v35 = vpack.c.bf16 %v3665_v31, %v3654_v27  ;;  %v115_v37 = vsel %vm81_vm0, %v48_v33, 0.0  ;;  %v15_v38 = vld [vmem:[%s5581_s0] sm:$0xff]  ;;  %v152_v41 = vrot.slane %v83_v36, 4  ;;  %v611_v45 = vld [vmem:[%s5582_s1 + $0x288] sm:$0xff]  ;;  %v18_v46 = vld [vmem:[%s5581_s0 + $0x18] sm:$0xff] }
  0x18   :  { %2929 = vmatprep.subr.bf16.mxu1 %v2928_v13  ;;  %v47_v39 = vld [vmem:[%s5581_s0 + $0x100] sm:$0xff]  ;;  %v344_v42 = vrot.slane %v115_v37, 4  ;;  %v82_v43 = vsel %vm81_vm0, %v15_v38, 0.0  ;;  %v50_v50 = vld [vmem:[%s5581_s0 + $0x118] sm:$0xff]  ;;  %v85_v51 = vsel %vm81_vm0, %v18_v46, 0.0  ;;  %v3716_v53 = vld [vmem:[%s5582_s1 + $0x208] sm:$0xff] }
  0x19   :  { %v3690_v40 = vld [vmem:[%s5582_s1 + $0x280] sm:$0xff]  ;;  %v114_v44 = vsel %vm81_vm0, %v47_v39, 0.0  ;;  %2899 = vmatpush3.bf16.msra.mxu0 %v2898_v17  ;;  %v146_v47 = vrot.slane %v82_v43, 4  ;;  %v153_v54 = vadd.f32 %v152_v41, %v83_v36  ;;  %v117_v56 = vsel %vm81_vm0, %v50_v50, 0.0  ;;  %v643_v59 = vld [vmem:[%s5582_s1 + $0x388] sm:$0xff]  ;;  %v17_v60 = vld [vmem:[%s5581_s0 + $0x10] sm:$0xff] }
  0x1a   :  { %v338_v48 = vrot.slane %v114_v44, 4  ;;  %v2940_v49 = vpack.c.bf16 %v611_v45, %v3690_v40  ;;  %v3711_v52 = vld [vmem:[%s5582_s1 + $0x200] sm:$0xff]  ;;  %2901 = vmatprep.subr.bf16.mxu0 %v2900_v22  ;;  %v345_v55 = vadd.f32 %v344_v42, %v115_v37  ;;  %v164_v57 = vrot.slane %v85_v51, 4  ;;  %v49_v1 = vld [vmem:[%s5581_s0 + $0x110] sm:$0xff]  ;;  %v613_v19 = vld [vmem:[%s5582_s1 + $0x298] sm:$0xff] }
  0x1b   :  { %2931 = vmatpush3.bf16.msra.mxu1 %v2930_v21  ;;  %v642_v58 = vld [vmem:[%s5582_s1 + $0x380] sm:$0xff]  ;;  %v147_v61 = vadd.f32 %v146_v47, %v82_v43  ;;  %v356_v63 = vrot.slane %v117_v56, 4  ;;  %v2942_v0 = vpack.c.bf16 %v3716_v53, %v3711_v52  ;;  %v154_v2 = vrot.slane %v153_v54, 2  ;;  %v612_v37 = vld [vmem:[%s5582_s1 + $0x290] sm:$0xff]  ;;  %v597_v41 = vld [vmem:[%s5582_s1 + $0x218] sm:$0xff] }
  0x1c   :  { %2933 = vmatprep.subr.bf16.mxu1 %v2932_v24  ;;  %v339_v62 = vadd.f32 %v338_v48, %v114_v44  ;;  %v346_v4 = vrot.slane %v345_v55, 2  ;;  %v165_v5 = vadd.f32 %v164_v57, %v85_v51  ;;  %v2972_v6 = vpack.c.bf16 %v643_v59, %v642_v58  ;;  %v596_v40 = vld [vmem:[%s5582_s1 + $0x210] sm:$0xff]  ;;  %v614_v46 = vld [vmem:[%s5582_s1 + $0x2a0] sm:$0xff]  ;;  %v615_v47 = vld [vmem:[%s5582_s1 + $0x2a8] sm:$0xff] }
  0x1d   :  { %2903 = vmatpush3.bf16.msra.mxu0 %v2902_v23  ;;  %v148_v7 = vrot.slane %v147_v61, 2  ;;  %v357_v9 = vadd.f32 %v356_v63, %v117_v56  ;;  %v84_v10 = vsel %vm81_vm0, %v17_v60, 0.0  ;;  %v155_v11 = vadd.f32 %v154_v2, %v153_v54  ;;  %v627_v50 = vld [vmem:[%s5582_s1 + $0x308] sm:$0xff]  ;;  %v644_v51 = vld [vmem:[%s5582_s1 + $0x390] sm:$0xff]  ;;  %v645_v57 = vld [vmem:[%s5582_s1 + $0x398] sm:$0xff] }
  0x1e   :  { %v340_v8 = vrot.slane %v339_v62, 2  ;;  %2905 = vmatprep.subr.bf16.mxu0 %v2904_v29  ;;  %v347_v12 = vadd.f32 %v346_v4, %v345_v55  ;;  %v166_v13 = vrot.slane %v165_v5, 2  ;;  %v116_v14 = vsel %vm81_vm0, %v49_v1, 0.0  ;;  %v598_v58 = vld [vmem:[%s5582_s1 + $0x220] sm:$0xff]  ;;  %v599_v59 = vld [vmem:[%s5582_s1 + $0x228] sm:$0xff]  ;;  %v3789_v52 = vld [vmem:[%s5582_s1 + $0x310] sm:$0xff] }
  0x1f   :  { %2935 = vmatpush3.bf16.msra.mxu1 %v2934_v28  ;;  %v149_v15 = vadd.f32 %v148_v7, %v147_v61  ;;  %v358_v17 = vrot.slane %v357_v9, 2  ;;  %v158_v18 = vrot.slane %v84_v10, 4  ;;  %v156_v21 = vrot.slane %v155_v11, 1  ;;  %v3794_v53 = vld [vmem:[%s5582_s1 + $0x318] sm:$0xff]  ;;  %v3804_v63 = vld [vmem:[%s5582_s1 + $0x3a8] sm:$0xff]  ;;  %v3815_v4 = vld [vmem:[%s5582_s1 + $0x320] sm:$0xff] }
  0x20   :  { %2937 = vmatprep.subr.bf16.mxu1 %v2936_v34  ;;  %v341_v16 = vadd.f32 %v340_v8, %v339_v62  ;;  %v348_v22 = vrot.slane %v347_v12, 1  ;;  %v167_v23 = vadd.f32 %v166_v13, %v165_v5  ;;  %v350_v24 = vrot.slane %v116_v14, 4  ;;  %v3799_v62 = vld [vmem:[%s5582_s1 + $0x3a0] sm:$0xff]  ;;  %v617_v1 = vld [vmem:[%s5582_s1 + $0x2b8] sm:$0xff]  ;;  %v3820_v5 = vld [vmem:[%s5582_s1 + $0x328] sm:$0xff] }
  0x21   :  { %2907 = vmatpush3.bf16.msra.mxu0 %v2906_v30  ;;  %v150_v25 = vrot.slane %v149_v15, 1  ;;  %v359_v28 = vadd.f32 %v358_v17, %v357_v9  ;;  %v159_v29 = vadd.f32 %v158_v18, %v84_v10  ;;  %v157_v32 = vadd.f32 %v156_v21, %v155_v11  ;;  %v601_v7 = vld [vmem:[%s5582_s1 + $0x238] sm:$0xff]  ;;  %v3833_v8 = vld [vmem:[%s5582_s1 + $0x3b0] sm:$0xff]  ;;  %v619_v17 = vld [vmem:[%s5582_s1 + $0x2c8] sm:$0xff] }
  0x22   :  { %v342_v26 = vrot.slane %v341_v16, 1  ;;  %v349_v33 = vadd.f32 %v348_v22, %v347_v12  ;;  %2941 = vmatprep.subr.bf16.mxu0 %v2940_v49  ;;  %v168_v34 = vrot.slane %v167_v23, 1  ;;  %v351_v36 = vadd.f32 %v350_v24, %v116_v14  ;;  %v626_v49 = vld [vmem:[%s5582_s1 + $0x300] sm:$0xff]  ;;  %v3838_v11 = vld [vmem:[%s5582_s1 + $0x3b8] sm:$0xff]  ;;  %v3843_v12 = vld [vmem:[%s5582_s1 + $0x330] sm:$0xff] }
  0x23   :  { %2939 = vmatpush3.bf16.msra.mxu1 %v2938_v35  ;;  %v151_v20 = vadd.f32 %v150_v25, %v149_v15  ;;  %v360_v38 = vrot.slane %v359_v28, 1  ;;  %v160_v39 = vrot.slane %v159_v29, 2  ;;  %v2944_v45 = vpack.c.bf16 %v613_v19, %v612_v37  ;;  %v3848_v13 = vld [vmem:[%s5582_s1 + $0x338] sm:$0xff]  ;;  %v3859_v18 = vld [vmem:[%s5582_s1 + $0x240] sm:$0xff]  ;;  %v3875_v25 = vld [vmem:[%s5582_s1 + $0x3c8] sm:$0xff] }
  0x24   :  { %v343_v30 = vadd.f32 %v342_v26, %v341_v16  ;;  %2973 = vmatprep.subr.bf16.mxu1 %v2972_v6  ;;  %v1116_v27 = vsel %vm1114_vm1, %v349_v33, %v157_v32  ;;  %v169_v31 = vadd.f32 %v168_v34, %v167_v23  ;;  %v352_v35 = vrot.slane %v351_v36, 2  ;;  %v3825_v6 = vld [vmem:[%s5582_s1 + $0x230] sm:$0xff]  ;;  %v618_v16 = vld [vmem:[%s5582_s1 + $0x2c0] sm:$0xff]  ;;  %v3865_v23 = vld [vmem:[%s5582_s1 + $0x248] sm:$0xff] }
  0x25   :  { %1243 = vmatprep.mubr.f32.mxu0 %v1116_v27  ;;  %v361_v43 = vadd.f32 %v360_v38, %v359_v28  ;;  %v161_v44 = vadd.f32 %v160_v39, %v159_v29  ;;  %v2946_v56 = vpack.c.bf16 %v597_v41, %v596_v40  ;;  %v2948_v61 = vpack.c.bf16 %v615_v47, %v614_v46  ;;  %v3870_v24 = vld [vmem:[%s5582_s1 + $0x3c0] sm:$0xff]  ;;  %v3889_v32 = vld [vmem:[%s5582_s1 + $0x348] sm:$0xff]  ;;  %v3901_v19 = vld [vmem:[%s5582_s1 + $0x2d0] sm:$0xff] }
  0x26   :  { %v1115_v42 = vsel %vm1114_vm1, %v343_v30, %v151_v20  ;;  %v353_v48 = vadd.f32 %v352_v35, %v351_v36  ;;  %v2974_v10 = vpack.c.bf16 %v627_v50, %v626_v49  ;;  %v2976_v14 = vpack.c.bf16 %v645_v57, %v644_v51  ;;  %v3884_v29 = vld [vmem:[%s5582_s1 + $0x340] sm:$0xff]  ;;  %v3906_v20 = vld [vmem:[%s5582_s1 + $0x2d8] sm:$0xff]  ;;  %v20_v30 = vld [vmem:[%s5581_s0 + $0x28] sm:$0xff] }
  0x27   :  { %1244 = vmatmul.mubr.f32.vlgmr.msra.gmra.mrb[0].mxu0 %v1115_v42  ;;  %v1118_v54 = vsel %vm1114_vm1, %v361_v43, %v169_v31  ;;  %v162_v55 = vrot.slane %v161_v44, 1  ;;  %v2950_v15 = vpack.c.bf16 %v599_v59, %v598_v58  ;;  %v2978_v26 = vpack.c.bf16 %v3794_v53, %v3789_v52  ;;  %v3918_v31 = vld [vmem:[%s5582_s1 + $0x250] sm:$0xff]  ;;  %v52_v35 = vld [vmem:[%s5581_s0 + $0x128] sm:$0xff]  ;;  %v19_v41 = vld [vmem:[%s5581_s0 + $0x20] sm:$0xff] }
  0x28   :  { %2943 = vmatpush3.bf16.msra.mxu0 %v2942_v0  ;;  %1313 = vmatprep.mubr.f32.mxu1 %v1118_v54  ;;  %v354_v60 = vrot.slane %v353_v48, 1  ;;  %v616_v0 = vld [vmem:[%s5582_s1 + $0x2b0] sm:$0xff]  ;;  %v2980_v28 = vpack.c.bf16 %v3804_v63, %v3799_v62  ;;  %v2982_v33 = vpack.c.bf16 %v3820_v5, %v3815_v4  ;;  %v2954_v34 = vpack.c.bf16 %v601_v7, %v3825_v6  ;;  %v51_v42 = vld [vmem:[%s5581_s0 + $0x120] sm:$0xff]  ;;  %v3934_v43 = vld [vmem:[%s5582_s1 + $0x258] sm:$0xff] }
  0x29   :  { %2945 = vmatprep.subr.bf16.mxu0 %v2944_v45  ;;  %v163_v2 = vadd.f32 %v162_v55, %v161_v44  ;;  %v2952_v22 = vpack.c.bf16 %v617_v1, %v616_v0  ;;  %v2984_v36 = vpack.c.bf16 %v3838_v11, %v3833_v8  ;;  %v2986_v37 = vpack.c.bf16 %v3848_v13, %v3843_v12  ;;  %v3939_v44 = vld [vmem:[%s5582_s1 + $0x2e0] sm:$0xff]  ;;  %v3952_v50 = vld [vmem:[%s5582_s1 + $0x2e8] sm:$0xff]  ;;  %v54_v57 = vld [vmem:[%s5581_s0 + $0x138] sm:$0xff] }
  0x2a   :  { %v355_v9 = vadd.f32 %v354_v60, %v353_v48  ;;  %v2956_v38 = vpack.c.bf16 %v619_v17, %v618_v16  ;;  %v2958_v39 = vpack.c.bf16 %v3865_v23, %v3859_v18  ;;  %v2988_v27 = vpack.c.bf16 %v3875_v25, %v3870_v24  ;;  %v21_v0 = vld [vmem:[%s5581_s0 + $0x30] sm:$0xff]  ;;  %v607_v16 = vld [vmem:[%s5582_s1 + $0x268] sm:$0xff] }
  0x2b   :  { %v87_v40 = vsel %vm81_vm0, %v20_v30, 0.0  ;;  %v119_v45 = vsel %vm81_vm0, %v52_v35, 0.0  ;;  %v86_v47 = vsel %vm81_vm0, %v19_v41, 0.0  ;;  %v118_v48 = vsel %vm81_vm0, %v51_v42, 0.0  ;;  %v53_v1 = vld [vmem:[%s5581_s0 + $0x130] sm:$0xff]  ;;  %v637_v42 = vld [vmem:[%s5582_s1 + $0x358] sm:$0xff] }
  0x2c   :  { %2947 = vmatpush3.bf16.msra.mxu0 %v2946_v56  ;;  %v1117_v21 = vsel %vm1114_vm1, %v355_v9, %v163_v2  ;;  %v176_v46 = vrot.slane %v87_v40, 4  ;;  %v2990_v49 = vpack.c.bf16 %v3889_v32, %v3884_v29  ;;  %v368_v51 = vrot.slane %v119_v45, 4  ;;  %v22_v56 = vld [vmem:[%s5581_s0 + $0x38] sm:$0xff]  ;;  %v3979_v7 = vld [vmem:[%s5582_s1 + $0x3d0] sm:$0xff] }
  0x2d   :  { %2949 = vmatprep.subr.bf16.mxu0 %v2948_v61  ;;  %1314 = vmatmul.mubr.f32.vlgmr.msra.gmra.mrb[0].mxu1 %v1117_v21  ;;  %v170_v54 = vrot.slane %v86_v47, 4  ;;  %v362_v55 = vrot.slane %v118_v48, 4  ;;  %v2960_v58 = vpack.c.bf16 %v3906_v20, %v3901_v19  ;;  %v89_v60 = vsel %vm81_vm0, %v22_v56, 0.0  ;;  %v656_v29 = vld [vmem:[%s5582_s1 + $0x3f0] sm:$0xff]  ;;  %v657_v32 = vld [vmem:[%s5582_s1 + $0x3f8] sm:$0xff] }
  0x2e   :  { %2975 = vmatpush3.bf16.msra.mxu1 %v2974_v10  ;;  %v177_v59 = vadd.f32 %v176_v46, %v87_v40  ;;  %v121_v52 = vsel %vm81_vm0, %v54_v57, 0.0  ;;  %v369_v53 = vadd.f32 %v368_v51, %v119_v45  ;;  %v188_v63 = vrot.slane %v89_v60, 4 }
  0x2f   :  { %2977 = vmatprep.subr.bf16.mxu1 %v2976_v14  ;;  %v171_v61 = vadd.f32 %v170_v54, %v86_v47  ;;  %v363_v62 = vadd.f32 %v362_v55, %v118_v48  ;;  %v2962_v2 = vpack.c.bf16 %v3934_v43, %v3918_v31  ;;  %v2964_v4 = vpack.c.bf16 %v3952_v50, %v3939_v44  ;;  %v653_v14 = vld [vmem:[%s5582_s1 + $0x3d8] sm:$0xff]  ;;  %v636_v31 = vld [vmem:[%s5582_s1 + $0x350] sm:$0xff]  ;;  %v654_v43 = vld [vmem:[%s5582_s1 + $0x3e0] sm:$0xff] }
  0x30   :  { %2951 = vmatpush3.bf16.msra.mxu0 %v2950_v15  ;;  %v178_v5 = vrot.slane %v177_v59, 2  ;;  %v380_v6 = vrot.slane %v121_v52, 4  ;;  %v370_v8 = vrot.slane %v369_v53, 2  ;;  %v189_v11 = vadd.f32 %v188_v63, %v89_v60  ;;  %v606_v15 = vld [vmem:[%s5582_s1 + $0x260] sm:$0xff]  ;;  %v655_v44 = vld [vmem:[%s5582_s1 + $0x3e8] sm:$0xff]  ;;  %v608_v54 = vld [vmem:[%s5582_s1 + $0x270] sm:$0xff] }
  0x31   :  { %2953 = vmatprep.subr.bf16.mxu0 %v2952_v22  ;;  %v172_v9 = vrot.slane %v171_v61, 2  ;;  %v364_v10 = vrot.slane %v363_v62, 2  ;;  %v88_v21 = vsel %vm81_vm0, %v21_v0, 0.0  ;;  %v120_v22 = vsel %vm81_vm0, %v53_v1, 0.0  ;;  %v609_v55 = vld [vmem:[%s5582_s1 + $0x278] sm:$0xff]  ;;  %v675_v60 = vld [vmem:[%s5582_s1 + $0x488] sm:$0xff] }
  0x32   :  { %2979 = vmatpush3.bf16.msra.mxu1 %v2978_v26  ;;  %v179_v17 = vadd.f32 %v178_v5, %v177_v59  ;;  %v381_v18 = vadd.f32 %v380_v6, %v121_v52  ;;  %v371_v23 = vadd.f32 %v370_v8, %v369_v53  ;;  %v182_v20 = vrot.slane %v88_v21, 4  ;;  %v674_v59 = vld [vmem:[%s5582_s1 + $0x480] sm:$0xff]  ;;  %v639_v0 = vld [vmem:[%s5582_s1 + $0x368] sm:$0xff] }
  0x33   :  { %2981 = vmatprep.subr.bf16.mxu1 %v2980_v28  ;;  %v173_v26 = vadd.f32 %v172_v9, %v171_v61  ;;  %v365_v28 = vadd.f32 %v364_v10, %v363_v62  ;;  %v374_v30 = vrot.slane %v120_v22, 4  ;;  %v2966_v35 = vpack.c.bf16 %v607_v16, %v606_v15  ;;  %v638_v53 = vld [vmem:[%s5582_s1 + $0x360] sm:$0xff]  ;;  %v659_v8 = vld [vmem:[%s5582_s1 + $0x408] sm:$0xff]  ;;  %v641_v9 = vld [vmem:[%s5582_s1 + $0x378] sm:$0xff] }
  0x34   :  { %2955 = vmatpush3.bf16.msra.mxu0 %v2954_v34  ;;  %v180_v34 = vrot.slane %v179_v17, 1  ;;  %v382_v19 = vrot.slane %v381_v18, 2  ;;  %v372_v40 = vrot.slane %v371_v23, 1  ;;  %v183_v47 = vadd.f32 %v182_v20, %v88_v21  ;;  %v676_v10 = vld [vmem:[%s5582_s1 + $0x490] sm:$0xff]  ;;  %v706_v15 = vld [vmem:[%s5582_s1 + $0x580] sm:$0xff]  ;;  %v707_v16 = vld [vmem:[%s5582_s1 + $0x588] sm:$0xff] }
  0x35   :  { %2957 = vmatprep.subr.bf16.mxu0 %v2956_v38  ;;  %v2992_v38 = vpack.c.bf16 %v653_v14, %v3979_v7  ;;  %v375_v48 = vadd.f32 %v374_v30, %v120_v22  ;;  %v174_v13 = vrot.slane %v173_v26, 1  ;;  %v2994_v24 = vpack.c.bf16 %v637_v42, %v636_v31  ;;  %v658_v7 = vld [vmem:[%s5582_s1 + $0x400] sm:$0xff]  ;;  %v4094_v20 = vld [vmem:[%s5582_s1 + $0x590] sm:$0xff]  ;;  %v4099_v30 = vld [vmem:[%s5582_s1 + $0x598] sm:$0xff] }
  0x36   :  { %2983 = vmatpush3.bf16.msra.mxu1 %v2982_v33  ;;  %v190_v33 = vrot.slane %v189_v11, 2  ;;  %v181_v45 = vadd.f32 %v180_v34, %v179_v17  ;;  %v383_v46 = vadd.f32 %v382_v19, %v381_v18  ;;  %v373_v12 = vadd.f32 %v372_v40, %v371_v23  ;;  %v4077_v21 = vld [vmem:[%s5582_s1 + $0x500] sm:$0xff]  ;;  %v661_v34 = vld [vmem:[%s5582_s1 + $0x418] sm:$0xff] }
  0x37   :  { %2985 = vmatprep.subr.bf16.mxu1 %v2984_v36  ;;  %v624_v36 = vld [vmem:[%s5582_s1 + $0x2f0] sm:$0xff]  ;;  %v184_v57 = vrot.slane %v183_v47, 2  ;;  %v2996_v25 = vpack.c.bf16 %v655_v44, %v654_v43  ;;  %v2970_v1 = vpack.c.bf16 %v609_v55, %v608_v54  ;;  %v3004_v5 = vpack.c.bf16 %v675_v60, %v674_v59 }
  0x38   :  { %2959 = vmatpush3.bf16.msra.mxu0 %v2958_v39  ;;  %v625_v39 = vld [vmem:[%s5582_s1 + $0x2f8] sm:$0xff]  ;;  %v191_v41 = vadd.f32 %v190_v33, %v189_v11  ;;  %v384_v56 = vrot.slane %v383_v46, 1  ;;  %v2998_v14 = vpack.c.bf16 %v639_v0, %v638_v53  ;;  %v3000_v22 = vpack.c.bf16 %v657_v32, %v656_v29  ;;  %v660_v33 = vld [vmem:[%s5582_s1 + $0x410] sm:$0xff]  ;;  %v4192_v32 = vld [vmem:[%s5582_s1 + $0x520] sm:$0xff] }
  0x39   :  { %2961 = vmatprep.subr.bf16.mxu0 %v2960_v58  ;;  %v2968_v51 = vpack.c.bf16 %v625_v39, %v624_v36  ;;  %v376_v58 = vrot.slane %v375_v48, 2  ;;  %v185_v62 = vadd.f32 %v184_v57, %v183_v47  ;;  %v677_v11 = vld [vmem:[%s5582_s1 + $0x498] sm:$0xff]  ;;  %v4111_v36 = vld [vmem:[%s5582_s1 + $0x420] sm:$0xff]  ;;  %v4116_v39 = vld [vmem:[%s5582_s1 + $0x428] sm:$0xff]  ;;  %v3036_v40 = vpack.c.bf16 %v707_v16, %v706_v15 }
  0x3a   :  { %2987 = vmatpush3.bf16.msra.mxu1 %v2986_v37  ;;  %v366_v37 = vrot.slane %v365_v28, 1  ;;  %v192_v50 = vrot.slane %v191_v41, 1  ;;  %v385_v61 = vadd.f32 %v384_v56, %v383_v46  ;;  %v3008_v19 = vpack.c.bf16 %v677_v11, %v676_v10  ;;  %v4125_v46 = vld [vmem:[%s5582_s1 + $0x510] sm:$0xff]  ;;  %v4130_v47 = vld [vmem:[%s5582_s1 + $0x518] sm:$0xff]  ;;  %v23_v57 = vld [vmem:[%s5581_s0 + $0x40] sm:$0xff] }
  0x3b   :  { %2989 = vmatprep.subr.bf16.mxu1 %v2988_v27  ;;  %v1120_v27 = vsel %vm1114_vm1, %v373_v12, %v181_v45  ;;  %v377_v63 = vadd.f32 %v376_v58, %v375_v48  ;;  %v186_v17 = vrot.slane %v185_v62, 1  ;;  %v3010_v44 = vpack.c.bf16 %v661_v34, %v660_v33  ;;  %v4135_v48 = vld [vmem:[%s5582_s1 + $0x5a0] sm:$0xff]  ;;  %v4140_v12 = vld [vmem:[%s5582_s1 + $0x5a8] sm:$0xff]  ;;  %v680_v54 = vld [vmem:[%s5582_s1 + $0x4b0] sm:$0xff] }
  0x3c   :  { %2963 = vmatpush3.bf16.msra.mxu0 %v2962_v2  ;;  %v193_v52 = vadd.f32 %v192_v50, %v191_v41  ;;  %1383 = vmatprep.mubr.f32.mxu0 %v1120_v27  ;;  %v367_v2 = vadd.f32 %v366_v37, %v365_v28  ;;  %v4083_v28 = vld [vmem:[%s5582_s1 + $0x508] sm:$0xff]  ;;  %v3040_v45 = vpack.c.bf16 %v4099_v30, %v4094_v20  ;;  %v55_v58 = vld [vmem:[%s5581_s0 + $0x140] sm:$0xff]  ;;  %v90_v59 = vsel %vm81_vm0, %v23_v57, 0.0  ;;  %v4211_v11 = vld [vmem:[%s5582_s1 + $0x5b0] sm:$0xff] }
  0x3d   :  { %2965 = vmatprep.subr.bf16.mxu0 %v2964_v4  ;;  %v4050_v4 = vld [vmem:[%s5582_s1 + $0x370] sm:$0xff]  ;;  %v378_v18 = vrot.slane %v377_v63, 1  ;;  %v187_v41 = vadd.f32 %v186_v17, %v185_v62  ;;  %v3038_v43 = vpack.c.bf16 %v4083_v28, %v4077_v21  ;;  %v56_v37 = vld [vmem:[%s5581_s0 + $0x148] sm:$0xff]  ;;  %v122_v60 = vsel %vm81_vm0, %v55_v58, 0.0  ;;  %v4182_v62 = vld [vmem:[%s5582_s1 + $0x438] sm:$0xff] }
  0x3e   :  { %2991 = vmatpush3.bf16.msra.mxu1 %v2990_v49  ;;  %v175_v49 = vadd.f32 %v174_v13, %v173_v26  ;;  %v1122_v6 = vsel %vm1114_vm1, %v385_v61, %v193_v52  ;;  %v3006_v26 = vpack.c.bf16 %v659_v8, %v658_v7  ;;  %v3002_v31 = vpack.c.bf16 %v641_v9, %v4050_v4  ;;  %v24_v13 = vld [vmem:[%s5581_s0 + $0x48] sm:$0xff]  ;;  %v26_v52 = vld [vmem:[%s5581_s0 + $0x58] sm:$0xff]  ;;  %v4177_v61 = vld [vmem:[%s5582_s1 + $0x430] sm:$0xff] }
  0x3f   :  { %2993 = vmatprep.subr.bf16.mxu1 %v2992_v38  ;;  %1453 = vmatprep.mubr.f32.mxu1 %v1122_v6  ;;  %v678_v38 = vld [vmem:[%s5582_s1 + $0x4a0] sm:$0xff]  ;;  %v379_v42 = vadd.f32 %v378_v18, %v377_v63  ;;  %v91_v55 = vsel %vm81_vm0, %v24_v13, 0.0  ;;  %v123_v56 = vsel %vm81_vm0, %v56_v37, 0.0  ;;  %v194_v63 = vrot.slane %v90_v59, 4  ;;  %v25_v6 = vld [vmem:[%s5581_s0 + $0x50] sm:$0xff]  ;;  %v4206_v9 = vld [vmem:[%s5582_s1 + $0x528] sm:$0xff] }
  0x40   :  { %2967 = vmatpush3.bf16.msra.mxu0 %v2966_v35  ;;  %v1119_v23 = vsel %vm1114_vm1, %v367_v2, %v175_v49  ;;  %v679_v35 = vld [vmem:[%s5582_s1 + $0x4a8] sm:$0xff]  ;;  %v392_v27 = vrot.slane %v123_v56, 4  ;;  %v386_v0 = vrot.slane %v122_v60, 4  ;;  %v93_v29 = vsel %vm81_vm0, %v26_v52, 0.0  ;;  %v57_v15 = vld [vmem:[%s5581_s0 + $0x150] sm:$0xff]  ;;  %v713_v17 = vld [vmem:[%s5582_s1 + $0x5b8] sm:$0xff] }
  0x41   :  { %2969 = vmatprep.subr.bf16.mxu0 %v2968_v51  ;;  %v3012_v50 = vpack.c.bf16 %v679_v35, %v678_v38  ;;  %v3014_v51 = vpack.c.bf16 %v4116_v39, %v4111_v36  ;;  %v1121_v53 = vsel %vm1114_vm1, %v379_v42, %v187_v41  ;;  %v3042_v7 = vpack.c.bf16 %v4130_v47, %v4125_v46  ;;  %v682_v18 = vld [vmem:[%s5582_s1 + $0x4c0] sm:$0xff]  ;;  %v683_v21 = vld [vmem:[%s5582_s1 + $0x4c8] sm:$0xff]  ;;  %v685_v46 = vld [vmem:[%s5582_s1 + $0x4d8] sm:$0xff] }
  0x42   :  { %2995 = vmatpush3.bf16.msra.mxu1 %v2994_v24  ;;  %v681_v24 = vld [vmem:[%s5582_s1 + $0x4b8] sm:$0xff]  ;;  %v393_v2 = vadd.f32 %v392_v27, %v123_v56  ;;  %v3044_v8 = vpack.c.bf16 %v4140_v12, %v4135_v48  ;;  %v3018_v16 = vpack.c.bf16 %v4182_v62, %v4177_v61  ;;  %v666_v28 = vld [vmem:[%s5582_s1 + $0x440] sm:$0xff]  ;;  %v667_v33 = vld [vmem:[%s5582_s1 + $0x448] sm:$0xff]  ;;  %v195_v34 = vadd.f32 %v194_v63, %v90_v59 }
  0x43   :  { %2997 = vmatprep.subr.bf16.mxu1 %v2996_v25  ;;  %v200_v25 = vrot.slane %v91_v55, 4  ;;  %v3016_v10 = vpack.c.bf16 %v681_v24, %v680_v54  ;;  %v92_v30 = vsel %vm81_vm0, %v25_v6, 0.0  ;;  %v124_v36 = vsel %vm81_vm0, %v57_v15, 0.0  ;;  %v697_v13 = vld [vmem:[%s5582_s1 + $0x538] sm:$0xff]  ;;  %v714_v37 = vld [vmem:[%s5582_s1 + $0x5c0] sm:$0xff]  ;;  %v668_v59 = vld [vmem:[%s5582_s1 + $0x450] sm:$0xff] }
  0x44   :  { %2971 = vmatpush3.bf16.msra.mxu0 %v2970_v1  ;;  %v58_v1 = vld [vmem:[%s5581_s0 + $0x158] sm:$0xff]  ;;  %v3046_v39 = vpack.c.bf16 %v4206_v9, %v4192_v32  ;;  %v3020_v41 = vpack.c.bf16 %v683_v21, %v682_v18  ;;  %v398_v56 = vrot.slane %v124_v36, 4  ;;  %v686_v62 = vld [vmem:[%s5582_s1 + $0x4e0] sm:$0xff]  ;;  %v687_v63 = vld [vmem:[%s5582_s1 + $0x4e8] sm:$0xff] }
  0x45   :  { %3005 = vmatprep.subr.bf16.mxu0 %v3004_v5  ;;  %v201_v49 = vadd.f32 %v200_v25, %v91_v55  ;;  %v125_v4 = vsel %vm81_vm0, %v58_v1, 0.0  ;;  %v212_v5 = vrot.slane %v93_v29, 4  ;;  %v206_v55 = vrot.slane %v92_v30, 4  ;;  %v716_v6 = vld [vmem:[%s5582_s1 + $0x5d0] sm:$0xff]  ;;  %v717_v9 = vld [vmem:[%s5582_s1 + $0x5d8] sm:$0xff] }
  0x46   :  { %2999 = vmatpush3.bf16.msra.mxu1 %v2998_v14  ;;  %v404_v14 = vrot.slane %v125_v4, 4  ;;  %v700_v21 = vld [vmem:[%s5582_s1 + $0x550] sm:$0xff] }
  0x47   :  { %1384 = vmatmul.mubr.f32.vlgmr.msra.gmra.mrb[2].mxu0 %v1119_v23  ;;  %3001 = vmatprep.subr.bf16.mxu1 %v3000_v22  ;;  %v202_v22 = vrot.slane %v201_v49, 2  ;;  %v394_v23 = vrot.slane %v393_v2, 2  ;;  %v207_v32 = vadd.f32 %v206_v55, %v92_v30  ;;  %v28_v55 = vld [vmem:[%s5581_s0 + $0x68] sm:$0xff] }
  0x48   :  { %3007 = vmatpush3.bf16.msra.mxu0 %v3006_v26  ;;  %v213_v26 = vadd.f32 %v212_v5, %v93_v29  ;;  %v405_v20 = vadd.f32 %v404_v14, %v125_v4  ;;  %v699_v4 = vld [vmem:[%s5582_s1 + $0x548] sm:$0xff] }
  0x49   :  { %3009 = vmatprep.subr.bf16.mxu0 %v3008_v19  ;;  %v387_v19 = vadd.f32 %v386_v0, %v122_v60  ;;  %v203_v38 = vadd.f32 %v202_v22, %v201_v49  ;;  %v669_v60 = vld [vmem:[%s5582_s1 + $0x458] sm:$0xff]  ;;  %v399_v49 = vadd.f32 %v398_v56, %v124_v36  ;;  %v671_v14 = vld [vmem:[%s5582_s1 + $0x468] sm:$0xff]  ;;  %v208_v22 = vrot.slane %v207_v32, 2  ;;  %v702_v36 = vld [vmem:[%s5582_s1 + $0x560] sm:$0xff] }
  0x4a   :  { %3003 = vmatpush3.bf16.msra.mxu1 %v3002_v31  ;;  %v395_v31 = vadd.f32 %v394_v23, %v393_v2  ;;  %v214_v35 = vrot.slane %v213_v26, 2  ;;  %v406_v42 = vrot.slane %v405_v20, 2  ;;  %v698_v2 = vld [vmem:[%s5582_s1 + $0x540] sm:$0xff]  ;;  %v3026_v5 = vpack.c.bf16 %v669_v60, %v668_v59  ;;  %v740_v60 = vld [vmem:[%s5582_s1 + $0x690] sm:$0xff] }
  0x4b   :  { %3037 = vmatprep.subr.bf16.mxu1 %v3036_v40  ;;  %v3048_v40 = vpack.c.bf16 %v713_v17, %v4211_v11  ;;  %v204_v47 = vrot.slane %v203_v38, 1  ;;  %v388_v24 = vrot.slane %v387_v19, 2  ;;  %v670_v11 = vld [vmem:[%s5582_s1 + $0x460] sm:$0xff]  ;;  %v689_v17 = vld [vmem:[%s5582_s1 + $0x4f8] sm:$0xff]  ;;  %v3054_v18 = vpack.c.bf16 %v699_v4, %v698_v2 }
  0x4c   :  { %3011 = vmatpush3.bf16.msra.mxu0 %v3010_v44  ;;  %v3022_v44 = vpack.c.bf16 %v667_v33, %v666_v28  ;;  %v396_v48 = vrot.slane %v395_v31, 1  ;;  %v215_v12 = vadd.f32 %v214_v35, %v213_v26  ;;  %v407_v54 = vadd.f32 %v406_v42, %v405_v20  ;;  %v701_v28 = vld [vmem:[%s5582_s1 + $0x558] sm:$0xff] }
  0x4d   :  { %3013 = vmatprep.subr.bf16.mxu0 %v3012_v50  ;;  %1454 = vmatmul.mubr.f32.vlgmr.msra.gmra.mrb[2].mxu1 %v1121_v53  ;;  %v715_v50 = vld [vmem:[%s5582_s1 + $0x5c8] sm:$0xff]  ;;  %v205_v57 = vadd.f32 %v204_v47, %v203_v38  ;;  %v400_v23 = vrot.slane %v399_v49, 2  ;;  %v3056_v26 = vpack.c.bf16 %v717_v9, %v716_v6  ;;  %v3030_v33 = vpack.c.bf16 %v671_v14, %v670_v11  ;;  %v673_v35 = vld [vmem:[%s5582_s1 + $0x478] sm:$0xff] }
  0x4e   :  { %3039 = vmatpush3.bf16.msra.mxu1 %v3038_v43  ;;  %v696_v43 = vld [vmem:[%s5582_s1 + $0x530] sm:$0xff]  ;;  %v397_v58 = vadd.f32 %v396_v48, %v395_v31  ;;  %v216_v25 = vrot.slane %v215_v12, 1  ;;  %v408_v52 = vrot.slane %v407_v54, 1  ;;  %v3052_v61 = vpack.c.bf16 %v715_v50, %v714_v37  ;;  %v62_v2 = vld [vmem:[%s5581_s0 + $0x178] sm:$0xff]  ;;  %v743_v11 = vld [vmem:[%s5582_s1 + $0x6a8] sm:$0xff] }
  0x4f   :  { %3041 = vmatprep.subr.bf16.mxu1 %v3040_v45  ;;  %v684_v45 = vld [vmem:[%s5582_s1 + $0x4d0] sm:$0xff]  ;;  %v3050_v53 = vpack.c.bf16 %v697_v13, %v696_v43  ;;  %v703_v43 = vld [vmem:[%s5582_s1 + $0x568] sm:$0xff]  ;;  %v401_v47 = vadd.f32 %v400_v23, %v399_v49  ;;  %v4344_v13 = vld [vmem:[%s5582_s1 + $0x578] sm:$0xff] }
  0x50   :  { %3015 = vmatpush3.bf16.msra.mxu0 %v3014_v51  ;;  %v196_v51 = vrot.slane %v195_v34, 2  ;;  %v3024_v27 = vpack.c.bf16 %v685_v46, %v684_v45  ;;  %v1124_v0 = vsel %vm1114_vm1, %v397_v58, %v205_v57  ;;  %v217_v1 = vadd.f32 %v216_v25, %v215_v12  ;;  %v672_v31 = vld [vmem:[%s5582_s1 + $0x470] sm:$0xff]  ;;  %v4334_v45 = vld [vmem:[%s5582_s1 + $0x5f8] sm:$0xff]  ;;  %v4358_v57 = vld [vmem:[%s5582_s1 + $0x780] sm:$0xff] }
  0x51   :  { %3017 = vmatprep.subr.bf16.mxu0 %v3016_v10  ;;  %1523 = vmatprep.mubr.f32.mxu0 %v1124_v0  ;;  %v409_v29 = vadd.f32 %v408_v52, %v407_v54  ;;  %v3028_v10 = vpack.c.bf16 %v687_v63, %v686_v62  ;;  %v209_v46 = vadd.f32 %v208_v22, %v207_v32  ;;  %v4339_v12 = vld [vmem:[%s5582_s1 + $0x570] sm:$0xff]  ;;  %v723_v54 = vld [vmem:[%s5582_s1 + $0x608] sm:$0xff]  ;;  %v95_v25 = vsel %vm81_vm0, %v28_v55, 0.0  ;;  %v741_v52 = vld [vmem:[%s5582_s1 + $0x698] sm:$0xff] }
  0x52   :  { %3043 = vmatpush3.bf16.msra.mxu1 %v3042_v7  ;;  %v197_v7 = vadd.f32 %v196_v51, %v195_v34  ;;  %v718_v34 = vld [vmem:[%s5582_s1 + $0x5e0] sm:$0xff]  ;;  %v3034_v48 = vpack.c.bf16 %v673_v35, %v672_v31  ;;  %v4363_v58 = vld [vmem:[%s5582_s1 + $0x788] sm:$0xff]  ;;  %v224_v62 = vrot.slane %v95_v25, 4  ;;  %v30_v49 = vld [vmem:[%s5581_s0 + $0x78] sm:$0xff]  ;;  %v3072_v9 = vpack.c.bf16 %v741_v52, %v740_v60 }
  0x53   :  { %3045 = vmatprep.subr.bf16.mxu1 %v3044_v8  ;;  %v389_v8 = vadd.f32 %v388_v24, %v387_v19  ;;  %v1126_v15 = vsel %vm1114_vm1, %v409_v29, %v217_v1  ;;  %v719_v19 = vld [vmem:[%s5582_s1 + $0x5e8] sm:$0xff]  ;;  %v722_v51 = vld [vmem:[%s5582_s1 + $0x600] sm:$0xff]  ;;  %v210_v0 = vrot.slane %v209_v46, 1  ;;  %v402_v1 = vrot.slane %v401_v47, 1  ;;  %v725_v29 = vld [vmem:[%s5582_s1 + $0x618] sm:$0xff] }
  0x54   :  { %3019 = vmatpush3.bf16.msra.mxu0 %v3018_v16  ;;  %v688_v16 = vld [vmem:[%s5582_s1 + $0x4f0] sm:$0xff]  ;;  %1593 = vmatprep.mubr.f32.mxu1 %v1126_v15  ;;  %v198_v20 = vrot.slane %v197_v7, 1  ;;  %v3060_v42 = vpack.c.bf16 %v719_v19, %v718_v34  ;;  %v60_v24 = vld [vmem:[%s5581_s0 + $0x168] sm:$0xff]  ;;  %v3070_v63 = vpack.c.bf16 %v723_v54, %v722_v51  ;;  %v97_v6 = vsel %vm81_vm0, %v30_v49, 0.0  ;;  %v27_v22 = vld [vmem:[%s5581_s0 + $0x60] sm:$0xff] }
  0x55   :  { %3021 = vmatprep.subr.bf16.mxu0 %v3020_v41  ;;  %v390_v30 = vrot.slane %v389_v8, 1  ;;  %v3032_v38 = vpack.c.bf16 %v689_v17, %v688_v16  ;;  %v3058_v41 = vpack.c.bf16 %v701_v28, %v700_v21  ;;  %v236_v15 = vrot.slane %v97_v6, 4  ;;  %v754_v17 = vld [vmem:[%s5582_s1 + $0x700] sm:$0xff]  ;;  %v755_v34 = vld [vmem:[%s5582_s1 + $0x708] sm:$0xff]  ;;  %v772_v19 = vld [vmem:[%s5582_s1 + $0x790] sm:$0xff] }
  0x56   :  { %3047 = vmatpush3.bf16.msra.mxu1 %v3046_v39  ;;  %v738_v39 = vld [vmem:[%s5582_s1 + $0x680] sm:$0xff]  ;;  %v199_v37 = vadd.f32 %v198_v20, %v197_v7  ;;  %v129_v7 = vsel %vm81_vm0, %v62_v2, 0.0  ;;  %v3100_v16 = vpack.c.bf16 %v4363_v58, %v4358_v57  ;;  %v211_v28 = vadd.f32 %v210_v0, %v209_v46  ;;  %v773_v20 = vld [vmem:[%s5582_s1 + $0x798] sm:$0xff]  ;;  %v61_v0 = vld [vmem:[%s5581_s0 + $0x170] sm:$0xff] }
  0x57   :  { %3049 = vmatprep.subr.bf16.mxu1 %v3048_v40  ;;  %v739_v40 = vld [vmem:[%s5582_s1 + $0x688] sm:$0xff]  ;;  %v391_v50 = vadd.f32 %v390_v30, %v389_v8  ;;  %v3066_v8 = vpack.c.bf16 %v4344_v13, %v4339_v12  ;;  %v59_v23 = vld [vmem:[%s5581_s0 + $0x160] sm:$0xff]  ;;  %v3104_v46 = vpack.c.bf16 %v773_v20, %v772_v19  ;;  %v745_v12 = vld [vmem:[%s5582_s1 + $0x6b8] sm:$0xff] }
  0x58   :  { %3023 = vmatpush3.bf16.msra.mxu0 %v3022_v44  ;;  %v4329_v44 = vld [vmem:[%s5582_s1 + $0x5f0] sm:$0xff]  ;;  %v3068_v56 = vpack.c.bf16 %v739_v40, %v738_v39  ;;  %v726_v35 = vld [vmem:[%s5582_s1 + $0x620] sm:$0xff]  ;;  %v757_v51 = vld [vmem:[%s5582_s1 + $0x718] sm:$0xff] }
  0x59   :  { %3025 = vmatprep.subr.bf16.mxu0 %v3024_v27  ;;  %v3062_v27 = vpack.c.bf16 %v703_v43, %v702_v36  ;;  %v3064_v59 = vpack.c.bf16 %v4334_v45, %v4329_v44  ;;  %v1123_v4 = vsel %vm1114_vm1, %v391_v50, %v199_v37  ;;  %v727_v36 = vld [vmem:[%s5582_s1 + $0x628] sm:$0xff]  ;;  %v126_v43 = vsel %vm81_vm0, %v59_v23, 0.0  ;;  %v774_v55 = vld [vmem:[%s5582_s1 + $0x7a0] sm:$0xff]  ;;  %v748_v23 = vld [vmem:[%s5582_s1 + $0x6d0] sm:$0xff] }
  0x5a   :  { %3051 = vmatpush3.bf16.msra.mxu1 %v3050_v53  ;;  %v4381_v53 = vld [vmem:[%s5582_s1 + $0x610] sm:$0xff]  ;;  %v3102_v45 = vpack.c.bf16 %v755_v34, %v754_v17  ;;  %v3078_v54 = vpack.c.bf16 %v727_v36, %v726_v35  ;;  %v410_v60 = vrot.slane %v126_v43, 4  ;;  %v747_v49 = vld [vmem:[%s5582_s1 + $0x6c8] sm:$0xff]  ;;  %v777_v17 = vld [vmem:[%s5582_s1 + $0x7b8] sm:$0xff] }
  0x5b   :  { %3053 = vmatprep.subr.bf16.mxu1 %v3052_v61  ;;  %v127_v61 = vsel %vm81_vm0, %v60_v24, 0.0  ;;  %v728_v24 = vld [vmem:[%s5582_s1 + $0x630] sm:$0xff]  ;;  %v761_v20 = vld [vmem:[%s5582_s1 + $0x738] sm:$0xff]  ;;  %v779_v36 = vld [vmem:[%s5582_s1 + $0x7c8] sm:$0xff] }
  0x5c   :  { %3027 = vmatpush3.bf16.msra.mxu0 %v3026_v5  ;;  %v416_v32 = vrot.slane %v127_v61, 4  ;;  %v225_v5 = vadd.f32 %v224_v62, %v95_v25  ;;  %v729_v25 = vld [vmem:[%s5582_s1 + $0x638] sm:$0xff]  ;;  %v760_v19 = vld [vmem:[%s5582_s1 + $0x730] sm:$0xff] }
  0x5d   :  { %3029 = vmatprep.subr.bf16.mxu0 %v3028_v10  ;;  %v742_v10 = vld [vmem:[%s5582_s1 + $0x6a0] sm:$0xff] }
  0x5e   :  { %3055 = vmatpush3.bf16.msra.mxu1 %v3054_v18  ;;  %v417_v14 = vadd.f32 %v416_v32, %v127_v61  ;;  %v3074_v18 = vpack.c.bf16 %v725_v29, %v4381_v53  ;;  %v226_v21 = vrot.slane %v225_v5, 2  ;;  %v3076_v31 = vpack.c.bf16 %v743_v11, %v742_v10  ;;  %v29_v53 = vld [vmem:[%s5581_s0 + $0x70] sm:$0xff]  ;;  %v746_v32 = vld [vmem:[%s5582_s1 + $0x6c0] sm:$0xff] }
  0x5f   :  { %3057 = vmatprep.subr.bf16.mxu1 %v3056_v26  ;;  %v428_v26 = vrot.slane %v129_v7, 4  ;;  %v776_v10 = vld [vmem:[%s5582_s1 + $0x7b0] sm:$0xff] }
  0x60   :  { %3031 = vmatpush3.bf16.msra.mxu0 %v3030_v33  ;;  %v403_v33 = vadd.f32 %v402_v1, %v401_v47  ;;  %v418_v30 = vrot.slane %v417_v14, 2  ;;  %v227_v39 = vadd.f32 %v226_v21, %v225_v5  ;;  %v756_v47 = vld [vmem:[%s5582_s1 + $0x710] sm:$0xff]  ;;  %v730_v21 = vld [vmem:[%s5582_s1 + $0x640] sm:$0xff] }
  0x61   :  { %3033 = vmatprep.subr.bf16.mxu0 %v3032_v38  ;;  %v237_v38 = vadd.f32 %v236_v15, %v97_v6  ;;  %v429_v40 = vadd.f32 %v428_v26, %v129_v7  ;;  %v3106_v1 = vpack.c.bf16 %v757_v51, %v756_v47  ;;  %v96_v7 = vsel %vm81_vm0, %v29_v53, 0.0  ;;  %v749_v26 = vld [vmem:[%s5582_s1 + $0x6d8] sm:$0xff]  ;;  %v4552_v51 = vld [vmem:[%s5582_s1 + $0x750] sm:$0xff] }
  0x62   :  { %3059 = vmatpush3.bf16.msra.mxu1 %v3058_v41  ;;  %v419_v41 = vadd.f32 %v418_v30, %v417_v14  ;;  %v228_v13 = vrot.slane %v227_v39, 1  ;;  %v1125_v50 = vsel %vm1114_vm1, %v403_v33, %v211_v28  ;;  %v411_v14 = vadd.f32 %v410_v60, %v126_v43  ;;  %v778_v30 = vld [vmem:[%s5582_s1 + $0x7c0] sm:$0xff]  ;;  %v4541_v47 = vld [vmem:[%s5582_s1 + $0x7d8] sm:$0xff] }
  0x63   :  { %3061 = vmatprep.subr.bf16.mxu1 %v3060_v42  ;;  %v94_v42 = vsel %vm81_vm0, %v27_v22, 0.0  ;;  %v238_v44 = vrot.slane %v237_v38, 2  ;;  %v430_v37 = vrot.slane %v429_v40, 2  ;;  %v731_v22 = vld [vmem:[%s5582_s1 + $0x648] sm:$0xff]  ;;  %v230_v33 = vrot.slane %v96_v7, 4  ;;  %v753_v53 = vld [vmem:[%s5582_s1 + $0x6f8] sm:$0xff] }
  0x64   :  { %3035 = vmatpush3.bf16.msra.mxu0 %v3034_v48  ;;  %v744_v48 = vld [vmem:[%s5582_s1 + $0x6b0] sm:$0xff]  ;;  %v420_v57 = vrot.slane %v419_v41, 1  ;;  %v3086_v35 = vpack.c.bf16 %v731_v22, %v730_v21  ;;  %v3088_v43 = vpack.c.bf16 %v749_v26, %v748_v23  ;;  %v766_v26 = vld [vmem:[%s5582_s1 + $0x760] sm:$0xff] }
  0x65   :  { %3069 = vmatprep.subr.bf16.mxu0 %v3068_v56  ;;  %v775_v56 = vld [vmem:[%s5582_s1 + $0x7a8] sm:$0xff]  ;;  %v239_v58 = vadd.f32 %v238_v44, %v237_v38  ;;  %v431_v52 = vadd.f32 %v430_v37, %v429_v40  ;;  %v3080_v61 = vpack.c.bf16 %v745_v12, %v744_v48  ;;  %v732_v44 = vld [vmem:[%s5582_s1 + $0x650] sm:$0xff]  ;;  %v750_v48 = vld [vmem:[%s5582_s1 + $0x6e0] sm:$0xff]  ;;  %v3114_v37 = vpack.c.bf16 %v761_v20, %v760_v19 }
  0x66   :  { %3063 = vmatpush3.bf16.msra.mxu1 %v3062_v27  ;;  %v229_v27 = vadd.f32 %v228_v13, %v227_v39  ;;  %v421_v62 = vadd.f32 %v420_v57, %v419_v41  ;;  %v3108_v29 = vpack.c.bf16 %v775_v56, %v774_v55  ;;  %v4520_v39 = vld [vmem:[%s5582_s1 + $0x740] sm:$0xff]  ;;  %v4525_v40 = vld [vmem:[%s5582_s1 + $0x748] sm:$0xff]  ;;  %v231_v13 = vadd.f32 %v230_v33, %v96_v7 }
  0x67   :  { %1524 = vmatmul.mubr.f32.vlgmr.msra.gmra.mrb[4].mxu0 %v1123_v4  ;;  %3065 = vmatprep.subr.bf16.mxu1 %v3064_v59  ;;  %v218_v59 = vrot.slane %v94_v42, 4  ;;  %v432_v2 = vrot.slane %v431_v52, 1  ;;  %v3082_v4 = vpack.c.bf16 %v729_v25, %v728_v24  ;;  %v751_v12 = vld [vmem:[%s5582_s1 + $0x6e8] sm:$0xff]  ;;  %v734_v57 = vld [vmem:[%s5582_s1 + $0x660] sm:$0xff]  ;;  %v752_v24 = vld [vmem:[%s5582_s1 + $0x6f0] sm:$0xff] }
  0x68   :  { %3071 = vmatpush3.bf16.msra.mxu0 %v3070_v63  ;;  %v240_v63 = vrot.slane %v239_v58, 1  ;;  %v1128_v5 = vsel %vm1114_vm1, %v421_v62, %v229_v27  ;;  %v64_v62 = vld [vmem:[%s5581_s0 + $0x188] sm:$0xff]  ;;  %v802_v33 = vld [vmem:[%s5582_s1 + $0x880] sm:$0xff] }
  0x69   :  { %3073 = vmatprep.subr.bf16.mxu0 %v3072_v9  ;;  %v759_v9 = vld [vmem:[%s5582_s1 + $0x728] sm:$0xff]  ;;  %v219_v11 = vadd.f32 %v218_v59, %v94_v42  ;;  %v433_v15 = vadd.f32 %v432_v2, %v431_v52  ;;  %1663 = vmatprep.mubr.f32.mxu0 %v1128_v5  ;;  %v412_v42 = vrot.slane %v411_v14, 2  ;;  %v3118_v59 = vpack.c.bf16 %v4525_v40, %v4520_v39  ;;  %v737_v5 = vld [vmem:[%s5582_s1 + $0x678] sm:$0xff] }
  0x6a   :  { %3067 = vmatpush3.bf16.msra.mxu1 %v3066_v8  ;;  %v241_v6 = vadd.f32 %v240_v63, %v239_v58  ;;  %v758_v8 = vld [vmem:[%s5582_s1 + $0x720] sm:$0xff]  ;;  %v735_v58 = vld [vmem:[%s5582_s1 + $0x668] sm:$0xff]  ;;  %v3092_v52 = vpack.c.bf16 %v751_v12, %v750_v48 }
  0x6b   :  { %3101 = vmatprep.subr.bf16.mxu1 %v3100_v16  ;;  %v128_v16 = vsel %vm81_vm0, %v61_v0, 0.0  ;;  %v3110_v34 = vpack.c.bf16 %v759_v9, %v758_v8  ;;  %v220_v41 = vrot.slane %v219_v11, 2  ;;  %v413_v27 = vadd.f32 %v412_v42, %v411_v14  ;;  %v4586_v0 = vld [vmem:[%s5582_s1 + $0x7e0] sm:$0xff]  ;;  %v34_v9 = vld [vmem:[%s5581_s0 + $0x98] sm:$0xff] }
  0x6c   :  { %3075 = vmatpush3.bf16.msra.mxu0 %v3074_v18  ;;  %v3084_v18 = vpack.c.bf16 %v747_v49, %v746_v32  ;;  %v1130_v28 = vsel %vm1114_vm1, %v433_v15, %v241_v6  ;;  %v422_v38 = vrot.slane %v128_v16, 4  ;;  %v131_v49 = vsel %vm81_vm0, %v64_v62, 0.0  ;;  %v66_v15 = vld [vmem:[%s5581_s0 + $0x198] sm:$0xff] }
  0x6d   :  { %3077 = vmatprep.subr.bf16.mxu0 %v3076_v31  ;;  %1594 = vmatmul.mubr.f32.vlgmr.msra.gmra.mrb[4].mxu1 %v1125_v50  ;;  %v3112_v31 = vpack.c.bf16 %v777_v17, %v776_v10  ;;  %v3116_v50 = vpack.c.bf16 %v779_v36, %v778_v30  ;;  %v221_v25 = vadd.f32 %v220_v41, %v219_v11  ;;  %v440_v8 = vrot.slane %v131_v49, 4  ;;  %v767_v30 = vld [vmem:[%s5582_s1 + $0x768] sm:$0xff] }
  0x6e   :  { %3103 = vmatpush3.bf16.msra.mxu1 %v3102_v45  ;;  %1733 = vmatprep.mubr.f32.mxu1 %v1130_v28  ;;  %v733_v45 = vld [vmem:[%s5582_s1 + $0x658] sm:$0xff]  ;;  %v423_v55 = vadd.f32 %v422_v38, %v128_v16  ;;  %v3094_v2 = vpack.c.bf16 %v735_v58, %v734_v57  ;;  %v3096_v10 = vpack.c.bf16 %v753_v53, %v752_v24  ;;  %v414_v14 = vrot.slane %v413_v27, 1  ;;  %v784_v38 = vld [vmem:[%s5582_s1 + $0x7f0] sm:$0xff]  ;;  %v834_v58 = vld [vmem:[%s5582_s1 + $0x980] sm:$0xff] }
  0x6f   :  { %3105 = vmatprep.subr.bf16.mxu1 %v3104_v46  ;;  %v4536_v46 = vld [vmem:[%s5582_s1 + $0x7d0] sm:$0xff]  ;;  %v3090_v56 = vpack.c.bf16 %v733_v45, %v732_v44  ;;  %v222_v11 = vrot.slane %v221_v25, 1  ;;  %v101_v16 = vsel %vm81_vm0, %v34_v9, 0.0  ;;  %v133_v21 = vsel %vm81_vm0, %v66_v15, 0.0  ;;  %v786_v45 = vld [vmem:[%s5582_s1 + $0x800] sm:$0xff]  ;;  %v769_v57 = vld [vmem:[%s5582_s1 + $0x778] sm:$0xff] }
  0x70   :  { %3079 = vmatpush3.bf16.msra.mxu0 %v3078_v54  ;;  %v4557_v54 = vld [vmem:[%s5582_s1 + $0x758] sm:$0xff]  ;;  %v3120_v60 = vpack.c.bf16 %v4541_v47, %v4536_v46  ;;  %v424_v6 = vrot.slane %v423_v55, 2  ;;  %v260_v22 = vrot.slane %v101_v16, 4  ;;  %v452_v20 = vrot.slane %v133_v21, 4  ;;  %v787_v46 = vld [vmem:[%s5582_s1 + $0x808] sm:$0xff]  ;;  %v818_v15 = vld [vmem:[%s5582_s1 + $0x900] sm:$0xff] }
  0x71   :  { %3081 = vmatprep.subr.bf16.mxu0 %v3080_v61  ;;  %v32_v61 = vld [vmem:[%s5581_s0 + $0x88] sm:$0xff]  ;;  %v3122_v63 = vpack.c.bf16 %v4557_v54, %v4552_v51  ;;  %v223_v41 = vadd.f32 %v222_v11, %v221_v25  ;;  %v415_v42 = vadd.f32 %v414_v14, %v413_v27  ;;  %v804_v54 = vld [vmem:[%s5582_s1 + $0x890] sm:$0xff]  ;;  %v3134_v53 = vpack.c.bf16 %v787_v46, %v786_v45 }
  0x72   :  { %3107 = vmatpush3.bf16.msra.mxu1 %v3106_v1  ;;  %v4591_v1 = vld [vmem:[%s5582_s1 + $0x7e8] sm:$0xff]  ;;  %v99_v32 = vsel %vm81_vm0, %v32_v61, 0.0  ;;  %v261_v40 = vadd.f32 %v260_v22, %v101_v16  ;;  %v31_v61 = vld [vmem:[%s5581_s0 + $0x80] sm:$0xff] }
  0x73   :  { %3109 = vmatprep.subr.bf16.mxu1 %v3108_v29  ;;  %v232_v29 = vrot.slane %v231_v13, 2  ;;  %v248_v7 = vrot.slane %v99_v32, 4  ;;  %v3124_v23 = vpack.c.bf16 %v4591_v1, %v4586_v0  ;;  %v835_v24 = vld [vmem:[%s5582_s1 + $0x988] sm:$0xff]  ;;  %v788_v0 = vld [vmem:[%s5582_s1 + $0x810] sm:$0xff]  ;;  %v789_v1 = vld [vmem:[%s5582_s1 + $0x818] sm:$0xff]  ;;  %v98_v14 = vsel %vm81_vm0, %v31_v61, 0.0 }
  0x74   :  { %3083 = vmatpush3.bf16.msra.mxu0 %v3082_v4  ;;  %v736_v4 = vld [vmem:[%s5582_s1 + $0x670] sm:$0xff]  ;;  %v262_v12 = vrot.slane %v261_v40, 2  ;;  %v819_v16 = vld [vmem:[%s5582_s1 + $0x908] sm:$0xff]  ;;  %v794_v61 = vld [vmem:[%s5582_s1 + $0x840] sm:$0xff] }
  0x75   :  { %3085 = vmatprep.subr.bf16.mxu0 %v3084_v18  ;;  %v249_v17 = vadd.f32 %v248_v7, %v99_v32  ;;  %v441_v18 = vadd.f32 %v440_v8, %v131_v49  ;;  %v3098_v28 = vpack.c.bf16 %v737_v5, %v736_v4  ;;  %v233_v19 = vadd.f32 %v232_v29, %v231_v13  ;;  %v806_v5 = vld [vmem:[%s5582_s1 + $0x8a0] sm:$0xff] }
  0x76   :  { %3111 = vmatpush3.bf16.msra.mxu1 %v3110_v34  ;;  %v803_v34 = vld [vmem:[%s5582_s1 + $0x888] sm:$0xff]  ;;  %v3126_v13 = vpack.c.bf16 %v767_v30, %v766_v26  ;;  %v3164_v4 = vpack.c.bf16 %v835_v24, %v834_v58  ;;  %v63_v7 = vld [vmem:[%s5581_s0 + $0x180] sm:$0xff]  ;;  %v242_v30 = vrot.slane %v98_v14, 4  ;;  %v841_v58 = vld [vmem:[%s5582_s1 + $0x9b8] sm:$0xff] }
  0x77   :  { %3113 = vmatprep.subr.bf16.mxu1 %v3112_v31  ;;  %v785_v31 = vld [vmem:[%s5582_s1 + $0x7f8] sm:$0xff]  ;;  %v250_v36 = vrot.slane %v249_v17, 2  ;;  %v442_v39 = vrot.slane %v441_v18, 2  ;;  %v3132_v44 = vpack.c.bf16 %v803_v34, %v802_v33  ;;  %v234_v51 = vrot.slane %v233_v19, 1  ;;  %v791_v33 = vld [vmem:[%s5582_s1 + $0x828] sm:$0xff] }
  0x78   :  { %3087 = vmatpush3.bf16.msra.mxu0 %v3086_v35  ;;  %v425_v35 = vadd.f32 %v424_v6, %v423_v55  ;;  %v805_v55 = vld [vmem:[%s5582_s1 + $0x898] sm:$0xff]  ;;  %v807_v6 = vld [vmem:[%s5582_s1 + $0x8a8] sm:$0xff]  ;;  %v130_v34 = vsel %vm81_vm0, %v63_v7, 0.0 }
  0x79   :  { %3089 = vmatprep.subr.bf16.mxu0 %v3088_v43  ;;  %v453_v43 = vadd.f32 %v452_v20, %v133_v21  ;;  %v251_v47 = vadd.f32 %v250_v36, %v249_v17  ;;  %v443_v48 = vadd.f32 %v442_v39, %v441_v18  ;;  %v235_v9 = vadd.f32 %v234_v51, %v233_v19  ;;  %v836_v18 = vld [vmem:[%s5582_s1 + $0x990] sm:$0xff]  ;;  %v809_v20 = vld [vmem:[%s5582_s1 + $0x8b8] sm:$0xff] }
  0x7a   :  { %3115 = vmatpush3.bf16.msra.mxu1 %v3114_v37  ;;  %v3128_v37 = vpack.c.bf16 %v785_v31, %v784_v38  ;;  %v426_v25 = vrot.slane %v425_v35, 1  ;;  %v3138_v17 = vpack.c.bf16 %v789_v1, %v788_v0  ;;  %v3140_v26 = vpack.c.bf16 %v807_v6, %v806_v5  ;;  %v808_v19 = vld [vmem:[%s5582_s1 + $0x8b0] sm:$0xff]  ;;  %v821_v36 = vld [vmem:[%s5582_s1 + $0x918] sm:$0xff]  ;;  %v842_v5 = vld [vmem:[%s5582_s1 + $0x9c0] sm:$0xff] }
  0x7b   :  { %3117 = vmatprep.subr.bf16.mxu1 %v3116_v50  ;;  %v768_v50 = vld [vmem:[%s5582_s1 + $0x770] sm:$0xff]  ;;  %v252_v27 = vrot.slane %v251_v47, 1  ;;  %v3166_v31 = vpack.c.bf16 %v819_v16, %v818_v15  ;;  %v3144_v46 = vpack.c.bf16 %v809_v20, %v808_v19  ;;  %v243_v51 = vadd.f32 %v242_v30, %v98_v14  ;;  %v843_v6 = vld [vmem:[%s5582_s1 + $0x9c8] sm:$0xff]  ;;  %v814_v19 = vld [vmem:[%s5582_s1 + $0x8e0] sm:$0xff] }
  0x7c   :  { %3091 = vmatpush3.bf16.msra.mxu0 %v3090_v56  ;;  %v454_v56 = vrot.slane %v453_v43, 2  ;;  %v815_v20 = vld [vmem:[%s5582_s1 + $0x8e8] sm:$0xff] }
  0x7d   :  { %3093 = vmatprep.subr.bf16.mxu0 %v3092_v52  ;;  %v1127_v52 = vsel %vm1114_vm1, %v415_v42, %v223_v41  ;;  %v253_v29 = vadd.f32 %v252_v27, %v251_v47  ;;  %v838_v41 = vld [vmem:[%s5582_s1 + $0x9a0] sm:$0xff]  ;;  %v839_v42 = vld [vmem:[%s5582_s1 + $0x9a8] sm:$0xff]  ;;  %v793_v47 = vld [vmem:[%s5582_s1 + $0x838] sm:$0xff] }
  0x7e   :  { %3119 = vmatpush3.bf16.msra.mxu1 %v3118_v59  ;;  %v444_v59 = vrot.slane %v443_v48, 1  ;;  %v455_v62 = vadd.f32 %v454_v56, %v453_v43  ;;  %v792_v43 = vld [vmem:[%s5582_s1 + $0x830] sm:$0xff]  ;;  %v823_v56 = vld [vmem:[%s5582_s1 + $0x928] sm:$0xff]  ;;  %v4757_v27 = vld [vmem:[%s5582_s1 + $0x938] sm:$0xff] }
  0x7f   :  { %3121 = vmatprep.subr.bf16.mxu1 %v3120_v60  ;;  %v263_v60 = vadd.f32 %v262_v12, %v261_v40  ;;  %v65_v12 = vld [vmem:[%s5581_s0 + $0x190] sm:$0xff]  ;;  %v3146_v24 = vpack.c.bf16 %v793_v47, %v792_v43 }
  0x80   :  { %3095 = vmatpush3.bf16.msra.mxu0 %v3094_v2  ;;  %v445_v32 = vadd.f32 %v444_v59, %v443_v48  ;;  %v3130_v2 = vpack.c.bf16 %v769_v57, %v768_v50  ;;  %v456_v8 = vrot.slane %v455_v62, 1  ;;  %v33_v48 = vld [vmem:[%s5581_s0 + $0x90] sm:$0xff]  ;;  %v811_v50 = vld [vmem:[%s5582_s1 + $0x8c8] sm:$0xff] }
  0x81   :  { %3097 = vmatprep.subr.bf16.mxu0 %v3096_v10  ;;  %v264_v49 = vrot.slane %v263_v60, 1  ;;  %v427_v10 = vadd.f32 %v426_v25, %v425_v35  ;;  %v820_v35 = vld [vmem:[%s5582_s1 + $0x910] sm:$0xff] }
  0x82   :  { %3123 = vmatpush3.bf16.msra.mxu1 %v3122_v63  ;;  %v3136_v63 = vpack.c.bf16 %v805_v55, %v804_v54  ;;  %v1132_v11 = vsel %vm1114_vm1, %v445_v32, %v253_v29  ;;  %v457_v22 = vadd.f32 %v456_v8, %v455_v62  ;;  %v3170_v54 = vpack.c.bf16 %v821_v36, %v820_v35  ;;  %v840_v57 = vld [vmem:[%s5582_s1 + $0x9b0] sm:$0xff]  ;;  %v795_v62 = vld [vmem:[%s5582_s1 + $0x848] sm:$0xff]  ;;  %v813_v32 = vld [vmem:[%s5582_s1 + $0x8d8] sm:$0xff] }
  0x83   :  { %3125 = vmatprep.subr.bf16.mxu1 %v3124_v23  ;;  %v265_v21 = vadd.f32 %v264_v49, %v263_v60  ;;  %v837_v23 = vld [vmem:[%s5582_s1 + $0x998] sm:$0xff]  ;;  %v1129_v38 = vsel %vm1114_vm1, %v427_v10, %v235_v9  ;;  %v3172_v55 = vpack.c.bf16 %v839_v42, %v838_v41  ;;  %v4752_v25 = vld [vmem:[%s5582_s1 + $0x930] sm:$0xff]  ;;  %v100_v60 = vsel %vm81_vm0, %v33_v48, 0.0  ;;  %v826_v35 = vld [vmem:[%s5582_s1 + $0x940] sm:$0xff] }
  0x84   :  { %3099 = vmatpush3.bf16.msra.mxu0 %v3098_v28  ;;  %v790_v28 = vld [vmem:[%s5582_s1 + $0x820] sm:$0xff]  ;;  %v3168_v39 = vpack.c.bf16 %v837_v23, %v836_v18  ;;  %v3176_v1 = vpack.c.bf16 %v841_v58, %v840_v57  ;;  %v812_v29 = vld [vmem:[%s5582_s1 + $0x8d0] sm:$0xff]  ;;  %v244_v49 = vrot.slane %v243_v51, 2  ;;  %v254_v7 = vrot.slane %v100_v60, 4  ;;  %v70_v18 = vld [vmem:[%s5581_s0 + $0x1b8] sm:$0xff] }
  0x85   :  { %3133 = vmatprep.subr.bf16.mxu0 %v3132_v44  ;;  %v3142_v40 = vpack.c.bf16 %v791_v33, %v790_v28  ;;  %v434_v44 = vrot.slane %v130_v34, 4  ;;  %v1134_v45 = vsel %vm1114_vm1, %v457_v22, %v265_v21  ;;  %v3150_v14 = vpack.c.bf16 %v795_v62, %v794_v61  ;;  %v796_v22 = vld [vmem:[%s5582_s1 + $0x850] sm:$0xff]  ;;  %v797_v23 = vld [vmem:[%s5582_s1 + $0x858] sm:$0xff]  ;;  %v827_v36 = vld [vmem:[%s5582_s1 + $0x948] sm:$0xff] }
  0x86   :  { %3127 = vmatpush3.bf16.msra.mxu1 %v3126_v13  ;;  %v822_v13 = vld [vmem:[%s5582_s1 + $0x920] sm:$0xff]  ;;  %v3152_v21 = vpack.c.bf16 %v813_v32, %v812_v29  ;;  %v137_v33 = vsel %vm81_vm0, %v70_v18, 0.0  ;;  %v245_v30 = vadd.f32 %v244_v49, %v243_v51  ;;  %v3154_v43 = vpack.c.bf16 %v797_v23, %v796_v22  ;;  %v800_v62 = vld [vmem:[%s5582_s1 + $0x870] sm:$0xff] }
  0x87   :  { %1664 = vmatmul.mubr.f32.vlgmr.msra.gmra.mrb[6].mxu0 %v1127_v52  ;;  %3129 = vmatprep.subr.bf16.mxu1 %v3128_v37  ;;  %v810_v37 = vld [vmem:[%s5582_s1 + $0x8c0] sm:$0xff]  ;;  %v435_v59 = vadd.f32 %v434_v44, %v130_v34  ;;  %v132_v52 = vsel %vm81_vm0, %v65_v12, 0.0  ;;  %v3174_v0 = vpack.c.bf16 %v823_v56, %v822_v13  ;;  %v3180_v34 = vpack.c.bf16 %v843_v6, %v842_v5  ;;  %v844_v44 = vld [vmem:[%s5582_s1 + $0x9d0] sm:$0xff]  ;;  %v817_v56 = vld [vmem:[%s5582_s1 + $0x8f8] sm:$0xff] }
  0x88   :  { %3135 = vmatpush3.bf16.msra.mxu0 %v3134_v53  ;;  %1803 = vmatprep.mubr.f32.mxu0 %v1132_v11  ;;  %v3148_v53 = vpack.c.bf16 %v811_v50, %v810_v37  ;;  %v446_v8 = vrot.slane %v132_v52, 4  ;;  %v3178_v11 = vpack.c.bf16 %v4757_v27, %v4752_v25  ;;  %v476_v42 = vrot.slane %v137_v33, 4  ;;  %v798_v13 = vld [vmem:[%s5582_s1 + $0x860] sm:$0xff]  ;;  %v799_v37 = vld [vmem:[%s5582_s1 + $0x868] sm:$0xff]  ;;  %v829_v25 = vld [vmem:[%s5582_s1 + $0x958] sm:$0xff] }
  0x89   :  { %3137 = vmatprep.subr.bf16.mxu0 %v3136_v63  ;;  %v36_v63 = vld [vmem:[%s5581_s0 + $0xa8] sm:$0xff]  ;;  %v436_v15 = vrot.slane %v435_v59, 2  ;;  %v3156_v12 = vpack.c.bf16 %v815_v20, %v814_v19  ;;  %v3182_v51 = vpack.c.bf16 %v827_v36, %v826_v35  ;;  %v846_v27 = vld [vmem:[%s5582_s1 + $0x9e0] sm:$0xff]  ;;  %v3158_v61 = vpack.c.bf16 %v799_v37, %v798_v13  ;;  %v833_v35 = vld [vmem:[%s5582_s1 + $0x978] sm:$0xff] }
  0x8a   :  { %3131 = vmatpush3.bf16.msra.mxu1 %v3130_v2  ;;  %v68_v2 = vld [vmem:[%s5581_s0 + $0x1a8] sm:$0xff]  ;;  %v477_v50 = vadd.f32 %v476_v42, %v137_v33  ;;  %v868_v33 = vld [vmem:[%s5582_s1 + $0xa90] sm:$0xff]  ;;  %v898_v42 = vld [vmem:[%s5582_s1 + $0xb80] sm:$0xff] }
  0x8b   :  { %3165 = vmatprep.subr.bf16.mxu1 %v3164_v4  ;;  %v103_v4 = vsel %vm81_vm0, %v36_v63, 0.0  ;;  %v135_v9 = vsel %vm81_vm0, %v68_v2, 0.0  ;;  %v801_v63 = vld [vmem:[%s5582_s1 + $0x878] sm:$0xff]  ;;  %v867_v5 = vld [vmem:[%s5582_s1 + $0xa88] sm:$0xff]  ;;  %v870_v37 = vld [vmem:[%s5582_s1 + $0xaa0] sm:$0xff] }
  0x8c   :  { %3139 = vmatpush3.bf16.msra.mxu0 %v3138_v17  ;;  %v272_v10 = vrot.slane %v103_v4, 4  ;;  %v464_v16 = vrot.slane %v135_v9, 4  ;;  %v38_v17 = vld [vmem:[%s5581_s0 + $0xb8] sm:$0xff]  ;;  %v478_v29 = vrot.slane %v477_v50, 2 }
  0x8d   :  { %3141 = vmatprep.subr.bf16.mxu0 %v3140_v26  ;;  %1734 = vmatmul.mubr.f32.vlgmr.msra.gmra.mrb[6].mxu1 %v1129_v38  ;;  %v105_v28 = vsel %vm81_vm0, %v38_v17, 0.0  ;;  %v849_v17 = vld [vmem:[%s5582_s1 + $0x9f8] sm:$0xff] }
  0x8e   :  { %3167 = vmatpush3.bf16.msra.mxu1 %v3166_v31  ;;  %1873 = vmatprep.mubr.f32.mxu1 %v1134_v45  ;;  %v273_v26 = vadd.f32 %v272_v10, %v103_v4  ;;  %v465_v38 = vadd.f32 %v464_v16, %v135_v9  ;;  %v284_v31 = vrot.slane %v105_v28, 4  ;;  %v845_v45 = vld [vmem:[%s5582_s1 + $0x9d8] sm:$0xff]  ;;  %v866_v4 = vld [vmem:[%s5582_s1 + $0xa80] sm:$0xff]  ;;  %v3162_v9 = vpack.c.bf16 %v801_v63, %v800_v62  ;;  %v848_v16 = vld [vmem:[%s5582_s1 + $0x9f0] sm:$0xff] }
  0x8f   :  { %3169 = vmatprep.subr.bf16.mxu1 %v3168_v39  ;;  %v255_v39 = vadd.f32 %v254_v7, %v100_v60  ;;  %v246_v60 = vrot.slane %v245_v30, 1  ;;  %v479_v22 = vadd.f32 %v478_v29, %v477_v50  ;;  %v3196_v23 = vpack.c.bf16 %v867_v5, %v866_v4  ;;  %v871_v50 = vld [vmem:[%s5582_s1 + $0xaa8] sm:$0xff]  ;;  %v854_v62 = vld [vmem:[%s5582_s1 + $0xa20] sm:$0xff]  ;;  %v884_v5 = vld [vmem:[%s5582_s1 + $0xb10] sm:$0xff] }
  0x90   :  { %3143 = vmatpush3.bf16.msra.mxu0 %v3142_v40  ;;  %v447_v40 = vadd.f32 %v446_v8, %v132_v52  ;;  %v274_v41 = vrot.slane %v273_v26, 2  ;;  %v466_v47 = vrot.slane %v465_v38, 2  ;;  %v285_v48 = vadd.f32 %v284_v31, %v105_v28  ;;  %v830_v8 = vld [vmem:[%s5582_s1 + $0x960] sm:$0xff]  ;;  %v851_v28 = vld [vmem:[%s5582_s1 + $0xa08] sm:$0xff]  ;;  %v832_v31 = vld [vmem:[%s5582_s1 + $0x970] sm:$0xff] }
  0x91   :  { %3145 = vmatprep.subr.bf16.mxu0 %v3144_v46  ;;  %v437_v46 = vadd.f32 %v436_v15, %v435_v59  ;;  %v847_v59 = vld [vmem:[%s5582_s1 + $0x9e8] sm:$0xff]  ;;  %v256_v52 = vrot.slane %v255_v39, 2  ;;  %v247_v10 = vadd.f32 %v246_v60, %v245_v30  ;;  %v3194_v13 = vpack.c.bf16 %v833_v35, %v832_v31  ;;  %v886_v35 = vld [vmem:[%s5582_s1 + $0xb20] sm:$0xff] }
  0x92   :  { %3171 = vmatpush3.bf16.msra.mxu1 %v3170_v54  ;;  %v828_v54 = vld [vmem:[%s5582_s1 + $0x950] sm:$0xff]  ;;  %v275_v57 = vadd.f32 %v274_v41, %v273_v26  ;;  %v467_v58 = vadd.f32 %v466_v47, %v465_v38  ;;  %v3188_v2 = vpack.c.bf16 %v847_v59, %v846_v27  ;;  %v831_v15 = vld [vmem:[%s5582_s1 + $0x968] sm:$0xff]  ;;  %v850_v26 = vld [vmem:[%s5582_s1 + $0xa00] sm:$0xff]  ;;  %v3192_v38 = vpack.c.bf16 %v849_v17, %v848_v16 }
  0x93   :  { %3173 = vmatprep.subr.bf16.mxu1 %v3172_v55  ;;  %v816_v55 = vld [vmem:[%s5582_s1 + $0x8f0] sm:$0xff]  ;;  %v3186_v49 = vpack.c.bf16 %v829_v25, %v828_v54  ;;  %v3190_v30 = vpack.c.bf16 %v831_v15, %v830_v8  ;;  %v3198_v41 = vpack.c.bf16 %v851_v28, %v850_v26  ;;  %v67_v54 = vld [vmem:[%s5581_s0 + $0x1a0] sm:$0xff]  ;;  %v901_v59 = vld [vmem:[%s5582_s1 + $0xb98] sm:$0xff] }
  0x94   :  { %3147 = vmatpush3.bf16.msra.mxu0 %v3146_v24  ;;  %v3184_v24 = vpack.c.bf16 %v845_v45, %v844_v44  ;;  %v3160_v32 = vpack.c.bf16 %v817_v56, %v816_v55  ;;  %v276_v6 = vrot.slane %v275_v57, 1  ;;  %v468_v7 = vrot.slane %v467_v58, 1  ;;  %v852_v47 = vld [vmem:[%s5582_s1 + $0xa10] sm:$0xff]  ;;  %v855_v63 = vld [vmem:[%s5582_s1 + $0xa28] sm:$0xff]  ;;  %v857_v17 = vld [vmem:[%s5582_s1 + $0xa38] sm:$0xff] }
  0x95   :  { %3149 = vmatprep.subr.bf16.mxu0 %v3148_v53  ;;  %v448_v53 = vrot.slane %v447_v40, 2  ;;  %v480_v45 = vrot.slane %v479_v22, 1  ;;  %v900_v27 = vld [vmem:[%s5582_s1 + $0xb90] sm:$0xff]  ;;  %v903_v15 = vld [vmem:[%s5582_s1 + $0xba8] sm:$0xff] }
  0x96   :  { %3175 = vmatpush3.bf16.msra.mxu1 %v3174_v0  ;;  %v438_v0 = vrot.slane %v437_v46, 1  ;;  %v277_v19 = vadd.f32 %v276_v6, %v275_v57  ;;  %v469_v20 = vadd.f32 %v468_v7, %v467_v58  ;;  %v882_v58 = vld [vmem:[%s5582_s1 + $0xb00] sm:$0xff]  ;;  %v885_v6 = vld [vmem:[%s5582_s1 + $0xb18] sm:$0xff]  ;;  %v856_v16 = vld [vmem:[%s5582_s1 + $0xa30] sm:$0xff] }
  0x97   :  { %3177 = vmatprep.subr.bf16.mxu1 %v3176_v1  ;;  %v286_v1 = vrot.slane %v285_v48, 2  ;;  %v902_v7 = vld [vmem:[%s5582_s1 + $0xba0] sm:$0xff]  ;;  %v37_v26 = vld [vmem:[%s5581_s0 + $0xb0] sm:$0xff] }
  0x98   :  { %3151 = vmatpush3.bf16.msra.mxu0 %v3150_v14  ;;  %v449_v14 = vadd.f32 %v448_v53, %v447_v40  ;;  %v439_v18 = vadd.f32 %v438_v0, %v437_v46  ;;  %v481_v53 = vadd.f32 %v480_v45, %v479_v22  ;;  %v872_v0 = vld [vmem:[%s5582_s1 + $0xab0] sm:$0xff]  ;;  %v3236_v31 = vpack.c.bf16 %v903_v15, %v902_v7  ;;  %v891_v7 = vld [vmem:[%s5582_s1 + $0xb48] sm:$0xff]  ;;  %v909_v15 = vld [vmem:[%s5582_s1 + $0xbd8] sm:$0xff] }
  0x99   :  { %3153 = vmatprep.subr.bf16.mxu0 %v3152_v21  ;;  %v287_v21 = vadd.f32 %v286_v1, %v285_v48  ;;  %v853_v48 = vld [vmem:[%s5582_s1 + $0xa18] sm:$0xff]  ;;  %v134_v1 = vsel %vm81_vm0, %v67_v54, 0.0  ;;  %v69_v28 = vld [vmem:[%s5581_s0 + $0x1b0] sm:$0xff] }
  0x9a   :  { %3179 = vmatpush3.bf16.msra.mxu1 %v3178_v11  ;;  %v257_v11 = vadd.f32 %v256_v52, %v255_v39  ;;  %v450_v39 = vrot.slane %v449_v14, 1  ;;  %v1131_v40 = vsel %vm1114_vm1, %v439_v18, %v247_v10  ;;  %v3202_v25 = vpack.c.bf16 %v853_v48, %v852_v47  ;;  %v858_v47 = vld [vmem:[%s5582_s1 + $0xa40] sm:$0xff]  ;;  %v859_v48 = vld [vmem:[%s5582_s1 + $0xa48] sm:$0xff]  ;;  %v877_v54 = vld [vmem:[%s5582_s1 + $0xad8] sm:$0xff] }
  0x9b   :  { %3181 = vmatprep.subr.bf16.mxu1 %v3180_v34  ;;  %v869_v34 = vld [vmem:[%s5582_s1 + $0xa98] sm:$0xff]  ;;  %v288_v44 = vrot.slane %v287_v21, 1  ;;  %v458_v18 = vrot.slane %v134_v1, 4  ;;  %v136_v45 = vsel %vm81_vm0, %v69_v28, 0.0  ;;  %v892_v28 = vld [vmem:[%s5582_s1 + $0xb50] sm:$0xff] }
  0x9c   :  { %3155 = vmatpush3.bf16.msra.mxu0 %v3154_v43  ;;  %v258_v36 = vrot.slane %v257_v11, 1  ;;  %v899_v43 = vld [vmem:[%s5582_s1 + $0xb88] sm:$0xff]  ;;  %v3200_v46 = vpack.c.bf16 %v869_v34, %v868_v33  ;;  %v451_v57 = vadd.f32 %v450_v39, %v449_v14  ;;  %v3206_v14 = vpack.c.bf16 %v855_v63, %v854_v62 }
  0x9d   :  { %3157 = vmatprep.subr.bf16.mxu0 %v3156_v12  ;;  %v35_v12 = vld [vmem:[%s5581_s0 + $0xa0] sm:$0xff]  ;;  %v3228_v55 = vpack.c.bf16 %v899_v43, %v898_v42  ;;  %v289_v52 = vadd.f32 %v288_v44, %v287_v21  ;;  %v875_v33 = vld [vmem:[%s5582_s1 + $0xac8] sm:$0xff]  ;;  %v905_v42 = vld [vmem:[%s5582_s1 + $0xbb8] sm:$0xff]  ;;  %v459_v43 = vadd.f32 %v458_v18, %v134_v1  ;;  %v104_v44 = vsel %vm81_vm0, %v37_v26, 0.0 }
  0x9e   :  { %3183 = vmatpush3.bf16.msra.mxu1 %v3182_v51  ;;  %v1136_v51 = vsel %vm1114_vm1, %v469_v20, %v277_v19  ;;  %v259_v56 = vadd.f32 %v258_v36, %v257_v11  ;;  %v102_v60 = vsel %vm81_vm0, %v35_v12, 0.0  ;;  %v3232_v11 = vpack.c.bf16 %v901_v59, %v900_v27  ;;  %v42_v20 = vld [vmem:[%s5581_s0 + $0xd8] sm:$0xff]  ;;  %v887_v36 = vld [vmem:[%s5582_s1 + $0xb28] sm:$0xff] }
  0x9f   :  { %3185 = vmatprep.subr.bf16.mxu1 %v3184_v24  ;;  %v883_v24 = vld [vmem:[%s5582_s1 + $0xb08] sm:$0xff]  ;;  %v266_v8 = vrot.slane %v102_v60, 4  ;;  %v1138_v21 = vsel %vm1114_vm1, %v481_v53, %v289_v52  ;;  %v109_v12 = vsel %vm81_vm0, %v42_v20, 0.0  ;;  %v278_v59 = vrot.slane %v104_v44, 4  ;;  %v860_v53 = vld [vmem:[%s5582_s1 + $0xa50] sm:$0xff] }
  0xa0   :  { %3159 = vmatpush3.bf16.msra.mxu0 %v3158_v61  ;;  %v3204_v61 = vpack.c.bf16 %v871_v50, %v870_v37  ;;  %v3230_v29 = vpack.c.bf16 %v883_v24, %v882_v58  ;;  %v1133_v4 = vsel %vm1114_vm1, %v451_v57, %v259_v56  ;;  %v3238_v37 = vpack.c.bf16 %v887_v36, %v886_v35  ;;  %v888_v50 = vld [vmem:[%s5582_s1 + $0xb30] sm:$0xff]  ;;  %v889_v58 = vld [vmem:[%s5582_s1 + $0xb38] sm:$0xff]  ;;  %v906_v24 = vld [vmem:[%s5582_s1 + $0xbc0] sm:$0xff] }
  0xa1   :  { %3161 = vmatprep.subr.bf16.mxu0 %v3160_v32  ;;  %v873_v32 = vld [vmem:[%s5582_s1 + $0xab8] sm:$0xff]  ;;  %v267_v39 = vadd.f32 %v266_v8, %v102_v60  ;;  %v470_v60 = vrot.slane %v136_v45, 4  ;;  %v3214_v52 = vpack.c.bf16 %v859_v48, %v858_v47  ;;  %v460_v62 = vrot.slane %v459_v43, 2  ;;  %v911_v35 = vld [vmem:[%s5582_s1 + $0xbe8] sm:$0xff] }
  0xa2   :  { %3187 = vmatpush3.bf16.msra.mxu1 %v3186_v49  ;;  %v40_v49 = vld [vmem:[%s5581_s0 + $0xc8] sm:$0xff]  ;;  %v3208_v22 = vpack.c.bf16 %v873_v32, %v872_v0  ;;  %v308_v63 = vrot.slane %v109_v12, 4 }
  0xa3   :  { %3189 = vmatprep.subr.bf16.mxu1 %v3188_v2  ;;  %v72_v2 = vld [vmem:[%s5581_s0 + $0x1c8] sm:$0xff]  ;;  %v268_v27 = vrot.slane %v267_v39, 2 }
  0xa4   :  { %3163 = vmatpush3.bf16.msra.mxu0 %v3162_v9  ;;  %v107_v9 = vsel %vm81_vm0, %v40_v49, 0.0  ;;  %v139_v10 = vsel %vm81_vm0, %v72_v2, 0.0  ;;  %v878_v49 = vld [vmem:[%s5582_s1 + $0xae0] sm:$0xff]  ;;  %v879_v2 = vld [vmem:[%s5582_s1 + $0xae8] sm:$0xff] }
  0xa5   :  { %3197 = vmatprep.subr.bf16.mxu0 %v3196_v23  ;;  %v874_v23 = vld [vmem:[%s5582_s1 + $0xac0] sm:$0xff]  ;;  %v296_v34 = vrot.slane %v107_v9, 4  ;;  %v488_v19 = vrot.slane %v139_v10, 4 }
  0xa6   :  { %3191 = vmatpush3.bf16.msra.mxu1 %v3190_v30  ;;  %v74_v30 = vld [vmem:[%s5581_s0 + $0x1d8] sm:$0xff] }
  0xa7   :  { %1804 = vmatmul.mubr.f32.vlgmr.msra.gmra.mrb[8].mxu0 %v1131_v40  ;;  %3193 = vmatprep.subr.bf16.mxu1 %v3192_v38  ;;  %v3234_v38 = vpack.c.bf16 %v885_v6, %v884_v5  ;;  %v3210_v40 = vpack.c.bf16 %v857_v17, %v856_v16  ;;  %v489_v56 = vadd.f32 %v488_v19, %v139_v10  ;;  %v890_v6 = vld [vmem:[%s5582_s1 + $0xb40] sm:$0xff] }
  0xa8   :  { %3199 = vmatpush3.bf16.msra.mxu0 %v3198_v41  ;;  %1943 = vmatprep.mubr.f32.mxu0 %v1136_v51  ;;  %v904_v41 = vld [vmem:[%s5582_s1 + $0xbb0] sm:$0xff]  ;;  %v279_v10 = vadd.f32 %v278_v59, %v104_v44  ;;  %v461_v16 = vadd.f32 %v460_v62, %v459_v43  ;;  %v309_v17 = vadd.f32 %v308_v63, %v109_v12  ;;  %v865_v43 = vld [vmem:[%s5582_s1 + $0xa78] sm:$0xff]  ;;  %v915_v62 = vld [vmem:[%s5582_s1 + $0xc08] sm:$0xff] }
  0xa9   :  { %3201 = vmatprep.subr.bf16.mxu0 %v3200_v46  ;;  %v3212_v46 = vpack.c.bf16 %v875_v33, %v874_v23  ;;  %v876_v51 = vld [vmem:[%s5582_s1 + $0xad0] sm:$0xff]  ;;  %v3240_v57 = vpack.c.bf16 %v905_v42, %v904_v41  ;;  %v490_v5 = vrot.slane %v489_v56, 2  ;;  %v863_v23 = vld [vmem:[%s5582_s1 + $0xa68] sm:$0xff]  ;;  %v3246_v26 = vpack.c.bf16 %v891_v7, %v890_v6 }
  0xaa   :  { %3195 = vmatpush3.bf16.msra.mxu1 %v3194_v13  ;;  %v141_v13 = vsel %vm81_vm0, %v74_v30, 0.0  ;;  %v3216_v1 = vpack.c.bf16 %v877_v54, %v876_v51  ;;  %v880_v33 = vld [vmem:[%s5582_s1 + $0xaf0] sm:$0xff]  ;;  %v462_v44 = vrot.slane %v461_v16, 1  ;;  %v894_v54 = vld [vmem:[%s5582_s1 + $0xb60] sm:$0xff] }
  0xab   :  { %3229 = vmatprep.subr.bf16.mxu1 %v3228_v55  ;;  %v297_v55 = vadd.f32 %v296_v34, %v107_v9  ;;  %v500_v0 = vrot.slane %v141_v13, 4  ;;  %v269_v9 = vadd.f32 %v268_v27, %v267_v39  ;;  %v881_v34 = vld [vmem:[%s5582_s1 + $0xaf8] sm:$0xff]  ;;  %v491_v20 = vadd.f32 %v490_v5, %v489_v56  ;;  %v864_v42 = vld [vmem:[%s5582_s1 + $0xa70] sm:$0xff] }
  0xac   :  { %3203 = vmatpush3.bf16.msra.mxu0 %v3202_v25  ;;  %v907_v25 = vld [vmem:[%s5582_s1 + $0xbc8] sm:$0xff]  ;;  %v280_v39 = vrot.slane %v279_v10, 2  ;;  %v3224_v47 = vpack.c.bf16 %v881_v34, %v880_v33  ;;  %v913_v27 = vld [vmem:[%s5582_s1 + $0xbf8] sm:$0xff]  ;;  %v463_v59 = vadd.f32 %v462_v44, %v461_v16  ;;  %v932_v63 = vld [vmem:[%s5582_s1 + $0xc90] sm:$0xff] }
  0xad   :  { %3205 = vmatprep.subr.bf16.mxu0 %v3204_v61  ;;  %1874 = vmatmul.mubr.f32.vlgmr.msra.gmra.mrb[8].mxu1 %v1133_v4  ;;  %v861_v61 = vld [vmem:[%s5582_s1 + $0xa58] sm:$0xff]  ;;  %v3244_v32 = vpack.c.bf16 %v907_v25, %v906_v24  ;;  %v298_v4 = vrot.slane %v297_v55, 2  ;;  %v501_v18 = vadd.f32 %v500_v0, %v141_v13  ;;  %v270_v36 = vrot.slane %v269_v9, 1  ;;  %v930_v13 = vld [vmem:[%s5582_s1 + $0xc80] sm:$0xff]  ;;  %v895_v24 = vld [vmem:[%s5582_s1 + $0xb68] sm:$0xff] }
  0xae   :  { %3231 = vmatpush3.bf16.msra.mxu1 %v3230_v29  ;;  %2013 = vmatprep.mubr.f32.mxu1 %v1138_v21  ;;  %v3242_v29 = vpack.c.bf16 %v889_v58, %v888_v50  ;;  %v3218_v8 = vpack.c.bf16 %v861_v61, %v860_v53  ;;  %v3220_v21 = vpack.c.bf16 %v879_v2, %v878_v49  ;;  %v492_v51 = vrot.slane %v491_v20, 1  ;;  %v912_v25 = vld [vmem:[%s5582_s1 + $0xbf0] sm:$0xff]  ;;  %v914_v61 = vld [vmem:[%s5582_s1 + $0xc00] sm:$0xff]  ;;  %v933_v0 = vld [vmem:[%s5582_s1 + $0xc98] sm:$0xff] }
  0xaf   :  { %3233 = vmatprep.subr.bf16.mxu1 %v3232_v11  ;;  %v471_v11 = vadd.f32 %v470_v60, %v136_v45  ;;  %v299_v19 = vadd.f32 %v298_v4, %v297_v55  ;;  %v310_v45 = vrot.slane %v309_v17, 2  ;;  %v3226_v55 = vpack.c.bf16 %v865_v43, %v864_v42  ;;  %v896_v2 = vld [vmem:[%s5582_s1 + $0xb70] sm:$0xff]  ;;  %v897_v4 = vld [vmem:[%s5582_s1 + $0xb78] sm:$0xff] }
  0xb0   :  { %3207 = vmatpush3.bf16.msra.mxu0 %v3206_v14  ;;  %v908_v14 = vld [vmem:[%s5582_s1 + $0xbd0] sm:$0xff]  ;;  %v271_v56 = vadd.f32 %v270_v36, %v269_v9  ;;  %v3256_v49 = vpack.c.bf16 %v913_v27, %v912_v25  ;;  %v962_v9 = vld [vmem:[%s5582_s1 + $0xd80] sm:$0xff]  ;;  %v3264_v16 = vpack.c.bf16 %v933_v0, %v932_v63 }
  0xb1   :  { %3209 = vmatprep.subr.bf16.mxu0 %v3208_v22  ;;  %v862_v22 = vld [vmem:[%s5582_s1 + $0xa60] sm:$0xff]  ;;  %v3248_v30 = vpack.c.bf16 %v909_v15, %v908_v14  ;;  %v300_v50 = vrot.slane %v299_v19, 1  ;;  %v311_v60 = vadd.f32 %v310_v45, %v309_v17  ;;  %v917_v17 = vld [vmem:[%s5582_s1 + $0xc18] sm:$0xff] }
  0xb2   :  { %3235 = vmatpush3.bf16.msra.mxu1 %v3234_v38  ;;  %v893_v38 = vld [vmem:[%s5582_s1 + $0xb58] sm:$0xff]  ;;  %v3222_v41 = vpack.c.bf16 %v863_v23, %v862_v22  ;;  %v1135_v7 = vsel %vm1114_vm1, %v463_v59, %v271_v56  ;;  %v3258_v22 = vpack.c.bf16 %v897_v4, %v896_v2  ;;  %v935_v23 = vld [vmem:[%s5582_s1 + $0xca8] sm:$0xff] }
  0xb3   :  { %3237 = vmatprep.subr.bf16.mxu1 %v3236_v31  ;;  %v910_v31 = vld [vmem:[%s5582_s1 + $0xbe0] sm:$0xff]  ;;  %v3250_v48 = vpack.c.bf16 %v893_v38, %v892_v28  ;;  %v312_v14 = vrot.slane %v311_v60, 1 }
  0xb4   :  { %3211 = vmatpush3.bf16.msra.mxu0 %v3210_v40  ;;  %v472_v40 = vrot.slane %v471_v11, 2  ;;  %v3252_v12 = vpack.c.bf16 %v911_v35, %v910_v31  ;;  %v71_v28 = vld [vmem:[%s5581_s0 + $0x1c0] sm:$0xff] }
  0xb5   :  { %3213 = vmatprep.subr.bf16.mxu0 %v3212_v46  ;;  %v502_v46 = vrot.slane %v501_v18, 2 }
  0xb6   :  { %3239 = vmatpush3.bf16.msra.mxu1 %v3238_v37  ;;  %v931_v37 = vld [vmem:[%s5582_s1 + $0xc88] sm:$0xff]  ;;  %v473_v58 = vadd.f32 %v472_v40, %v471_v11  ;;  %v916_v11 = vld [vmem:[%s5582_s1 + $0xc10] sm:$0xff] }
  0xb7   :  { %3241 = vmatprep.subr.bf16.mxu1 %v3240_v57  ;;  %v281_v57 = vadd.f32 %v280_v39, %v279_v10  ;;  %v3260_v53 = vpack.c.bf16 %v931_v37, %v930_v13  ;;  %v963_v10 = vld [vmem:[%s5582_s1 + $0xd88] sm:$0xff] }
  0xb8   :  { %3215 = vmatpush3.bf16.msra.mxu0 %v3214_v52  ;;  %v503_v52 = vadd.f32 %v502_v46, %v501_v18  ;;  %v474_v6 = vrot.slane %v473_v58, 1  ;;  %v934_v18 = vld [vmem:[%s5582_s1 + $0xca0] sm:$0xff] }
  0xb9   :  { %3217 = vmatprep.subr.bf16.mxu0 %v3216_v1  ;;  %v301_v1 = vadd.f32 %v300_v50, %v299_v19  ;;  %v282_v5 = vrot.slane %v281_v57, 1 }
  0xba   :  { %3243 = vmatpush3.bf16.msra.mxu1 %v3242_v29  ;;  %v493_v29 = vadd.f32 %v492_v51, %v491_v20  ;;  %v504_v15 = vrot.slane %v503_v52, 1 }
  0xbb   :  { %3245 = vmatprep.subr.bf16.mxu1 %v3244_v32  ;;  %v3254_v32 = vpack.c.bf16 %v895_v24, %v894_v54 }
  0xbc   :  { %3219 = vmatpush3.bf16.msra.mxu0 %v3218_v8  ;;  %v3262_v8 = vpack.c.bf16 %v915_v62, %v914_v61 }
  0xbd   :  { %3221 = vmatprep.subr.bf16.mxu0 %v3220_v21  ;;  %v39_v21 = vld [vmem:[%s5581_s0 + $0xc0] sm:$0xff] }
  0xbe   :  { %3247 = vmatpush3.bf16.msra.mxu1 %v3246_v26  ;;  %v1140_v26 = vsel %vm1114_vm1, %v493_v29, %v301_v1 }
  0xbf   :  { %3249 = vmatprep.subr.bf16.mxu1 %v3248_v30 }
  0xc0   :  { %3223 = vmatpush3.bf16.msra.mxu0 %v3222_v41 }
  0xc1   :  { %3225 = vmatprep.subr.bf16.mxu0 %v3224_v47 }
  0xc2   :  { %3251 = vmatpush3.bf16.msra.mxu1 %v3250_v48 }
  0xc3   :  { %3253 = vmatprep.subr.bf16.mxu1 %v3252_v12 }
  0xc4   :  { %3227 = vmatpush3.bf16.msra.mxu0 %v3226_v55 }
  0xc5   :  { %3261 = vmatprep.subr.bf16.mxu0 %v3260_v53 }
  0xc6   :  { %8 = vsyncpa [#allocation3], 0  ;;  %3255 = vmatpush3.bf16.msra.mxu1 %v3254_v32  ;;  %v3292_v33 = vpack.c.bf16 %v963_v10, %v962_v9  ;;  %v283_v34 = vadd.f32 %v282_v5, %v281_v57  ;;  %v475_v19 = vadd.f32 %v474_v6, %v473_v58  ;;  %v946_v20 = vld [vmem:[%s5582_s1 + $0xd00] sm:$0xff]  ;;  %v947_v30 = vld [vmem:[%s5582_s1 + $0xd08] sm:$0xff]  ;;  %v3266_v38 = vpack.c.bf16 %v917_v17, %v916_v11 }
  0xc7   :  { %1944 = vmatmul.mubr.f32.vlgmr.msra.gmra.mrb[10].mxu0 %v1135_v7  ;;  %3257 = vmatprep.subr.bf16.mxu1 %v3256_v49  ;;  %v964_v31 = vld [vmem:[%s5582_s1 + $0xd90] sm:$0xff]  ;;  %v106_v35 = vsel %vm81_vm0, %v39_v21, 0.0  ;;  %v313_v36 = vadd.f32 %v312_v14, %v311_v60  ;;  %v505_v39 = vadd.f32 %v504_v15, %v503_v52  ;;  %v44_v40 = vld [vmem:[%s5581_s0 + $0xe8] sm:$0xff]  ;;  %v965_v42 = vld [vmem:[%s5582_s1 + $0xd98] sm:$0xff]  ;;  %v3268_v43 = vpack.c.bf16 %v935_v23, %v934_v18 }
  0xc8   :  { %3263 = vmatpush3.bf16.msra.mxu0 %v3262_v8  ;;  %v76_v41 = vld [vmem:[%s5581_s0 + $0x1e8] sm:$0xff]  ;;  %v918_v44 = vld [vmem:[%s5582_s1 + $0xc20] sm:$0xff]  ;;  %2083 = vmatprep.mubr.f32.mxu0 %v1140_v26  ;;  %v138_v46 = vsel %vm81_vm0, %v71_v28, 0.0  ;;  %v3294_v47 = vpack.c.bf16 %v947_v30, %v946_v20  ;;  %v936_v48 = vld [vmem:[%s5582_s1 + $0xcb0] sm:$0xff]  ;;  %v1137_v13 = vsel %vm1114_vm1, %v475_v19, %v283_v34  ;;  %v290_v54 = vrot.slane %v106_v35, 4 }
  0xc9   :  { %3265 = vmatprep.subr.bf16.mxu0 %v3264_v16  ;;  %v919_v45 = vld [vmem:[%s5582_s1 + $0xc28] sm:$0xff]  ;;  %v937_v12 = vld [vmem:[%s5582_s1 + $0xcb8] sm:$0xff]  ;;  %v948_v37 = vld [vmem:[%s5582_s1 + $0xd10] sm:$0xff]  ;;  %v111_v55 = vsel %vm81_vm0, %v44_v40, 0.0  ;;  %v143_v56 = vsel %vm81_vm0, %v76_v41, 0.0  ;;  %v3296_v57 = vpack.c.bf16 %v965_v42, %v964_v31  ;;  %v482_v59 = vrot.slane %v138_v46, 4 }
  0xca   :  { %3259 = vmatpush3.bf16.msra.mxu1 %v3258_v22  ;;  %v949_v50 = vld [vmem:[%s5582_s1 + $0xd18] sm:$0xff]  ;;  %v966_v51 = vld [vmem:[%s5582_s1 + $0xda0] sm:$0xff]  ;;  %v3270_v58 = vpack.c.bf16 %v919_v45, %v918_v44  ;;  %v967_v24 = vld [vmem:[%s5582_s1 + $0xda8] sm:$0xff]  ;;  %v1142_v60 = vsel %vm1114_vm1, %v505_v39, %v313_v36  ;;  %v3272_v52 = vpack.c.bf16 %v937_v12, %v936_v48  ;;  %v320_v0 = vrot.slane %v111_v55, 4 }
  0xcb   :  { %3293 = vmatprep.subr.bf16.mxu1 %v3292_v33  ;;  %v920_v25 = vld [vmem:[%s5582_s1 + $0xc30] sm:$0xff]  ;;  %v921_v27 = vld [vmem:[%s5582_s1 + $0xc38] sm:$0xff]  ;;  %v938_v53 = vld [vmem:[%s5582_s1 + $0xcc0] sm:$0xff]  ;;  %v512_v1 = vrot.slane %v143_v56, 4  ;;  %v3298_v49 = vpack.c.bf16 %v949_v50, %v948_v37  ;;  %v3300_v2 = vpack.c.bf16 %v967_v24, %v966_v51  ;;  %v291_v6 = vadd.f32 %v290_v54, %v106_v35 }
  0xcc   :  { %3267 = vmatpush3.bf16.msra.mxu0 %v3266_v38  ;;  %v41_v61 = vld [vmem:[%s5581_s0 + $0xd0] sm:$0xff]  ;;  %v939_v63 = vld [vmem:[%s5582_s1 + $0xcc8] sm:$0xff]  ;;  %v46_v29 = vld [vmem:[%s5581_s0 + $0xf8] sm:$0xff]  ;;  %v3274_v7 = vpack.c.bf16 %v921_v27, %v920_v25  ;;  %v483_v10 = vadd.f32 %v482_v59, %v138_v46  ;;  %v321_v33 = vadd.f32 %v320_v0, %v111_v55  ;;  %vm2300_vm2 = vcmask 74752  }
  0xcd   :  { %3269 = vmatprep.subr.bf16.mxu0 %v3268_v43  ;;  %v73_v62 = vld [vmem:[%s5581_s0 + $0x1d0] sm:$0xff]  ;;  %2014 = vmatmul.mubr.f32.vlgmr.msra.gmra.mrb[10].mxu1 %v1137_v13  ;;  %v78_v32 = vld [vmem:[%s5581_s0 + $0x1f8] sm:$0xff]  ;;  %v950_v4 = vld [vmem:[%s5582_s1 + $0xd20] sm:$0xff]  ;;  %v108_v11 = vsel %vm81_vm0, %v41_v61, 0.0  ;;  %v3276_v15 = vpack.c.bf16 %v939_v63, %v938_v53  ;;  %v113_v18 = vsel %vm81_vm0, %v46_v29, 0.0  ;;  %v513_v34 = vadd.f32 %v512_v1, %v143_v56 }
  0xce   :  { %3295 = vmatpush3.bf16.msra.mxu1 %v3294_v47  ;;  %v951_v5 = vld [vmem:[%s5582_s1 + $0xd28] sm:$0xff]  ;;  %2153 = vmatprep.mubr.f32.mxu1 %v1142_v60  ;;  %v968_v8 = vld [vmem:[%s5582_s1 + $0xdb0] sm:$0xff]  ;;  %v969_v9 = vld [vmem:[%s5582_s1 + $0xdb8] sm:$0xff]  ;;  %v140_v14 = vsel %vm81_vm0, %v73_v62, 0.0  ;;  %v145_v21 = vsel %vm81_vm0, %v78_v32, 0.0  ;;  %v292_v31 = vrot.slane %v291_v6, 2 }
  0xcf   :  { %3297 = vmatprep.subr.bf16.mxu1 %v3296_v57  ;;  %v922_v16 = vld [vmem:[%s5582_s1 + $0xc40] sm:$0xff]  ;;  %v923_v17 = vld [vmem:[%s5582_s1 + $0xc48] sm:$0xff]  ;;  %v3302_v22 = vpack.c.bf16 %v951_v5, %v950_v4  ;;  %v952_v23 = vld [vmem:[%s5582_s1 + $0xd30] sm:$0xff]  ;;  %v3304_v19 = vpack.c.bf16 %v969_v9, %v968_v8  ;;  %v302_v35 = vrot.slane %v108_v11, 4  ;;  %v494_v36 = vrot.slane %v140_v14, 4 }
  0xd0   :  { %3271 = vmatpush3.bf16.msra.mxu0 %v3270_v58  ;;  %v940_v26 = vld [vmem:[%s5582_s1 + $0xcd0] sm:$0xff]  ;;  %v941_v28 = vld [vmem:[%s5582_s1 + $0xcd8] sm:$0xff]  ;;  %v970_v30 = vld [vmem:[%s5582_s1 + $0xdc0] sm:$0xff]  ;;  %v3278_v39 = vpack.c.bf16 %v923_v17, %v922_v16  ;;  %v484_v42 = vrot.slane %v483_v10, 2  ;;  %v332_v43 = vrot.slane %v113_v18, 4  ;;  %v524_v44 = vrot.slane %v145_v21, 4 }
  0xd1   :  { %3273 = vmatprep.subr.bf16.mxu0 %v3272_v52  ;;  %v953_v20 = vld [vmem:[%s5582_s1 + $0xd38] sm:$0xff]  ;;  %v971_v38 = vld [vmem:[%s5582_s1 + $0xdc8] sm:$0xff]  ;;  %v924_v40 = vld [vmem:[%s5582_s1 + $0xc50] sm:$0xff]  ;;  %v3280_v45 = vpack.c.bf16 %v941_v28, %v940_v26  ;;  %v322_v13 = vrot.slane %v321_v33, 2  ;;  %v514_v37 = vrot.slane %v513_v34, 2  ;;  %v293_v55 = vadd.f32 %v292_v31, %v291_v6 }
  0xd2   :  { %3299 = vmatpush3.bf16.msra.mxu1 %v3298_v49  ;;  %v925_v41 = vld [vmem:[%s5582_s1 + $0xc58] sm:$0xff]  ;;  %v3306_v46 = vpack.c.bf16 %v953_v20, %v952_v23  ;;  %v3308_v47 = vpack.c.bf16 %v971_v38, %v970_v30  ;;  %v942_v48 = vld [vmem:[%s5582_s1 + $0xce0] sm:$0xff]  ;;  %v943_v12 = vld [vmem:[%s5582_s1 + $0xce8] sm:$0xff]  ;;  %v303_v56 = vadd.f32 %v302_v35, %v108_v11  ;;  %v495_v57 = vadd.f32 %v494_v36, %v140_v14 }
  0xd3   :  { %3301 = vmatprep.subr.bf16.mxu1 %v3300_v2  ;;  %v954_v50 = vld [vmem:[%s5582_s1 + $0xd40] sm:$0xff]  ;;  %v955_v51 = vld [vmem:[%s5582_s1 + $0xd48] sm:$0xff]  ;;  %v3282_v54 = vpack.c.bf16 %v925_v41, %v924_v40  ;;  %v972_v58 = vld [vmem:[%s5582_s1 + $0xdd0] sm:$0xff]  ;;  %v485_v25 = vadd.f32 %v484_v42, %v483_v10  ;;  %v333_v27 = vadd.f32 %v332_v43, %v113_v18  ;;  %v525_v59 = vadd.f32 %v524_v44, %v145_v21 }
  0xd4   :  { %3275 = vmatpush3.bf16.msra.mxu0 %v3274_v7  ;;  %v973_v24 = vld [vmem:[%s5582_s1 + $0xdd8] sm:$0xff]  ;;  %v3284_v60 = vpack.c.bf16 %v943_v12, %v942_v48  ;;  %v926_v52 = vld [vmem:[%s5582_s1 + $0xc60] sm:$0xff]  ;;  %v927_v53 = vld [vmem:[%s5582_s1 + $0xc68] sm:$0xff]  ;;  %v3310_v61 = vpack.c.bf16 %v955_v51, %v954_v50  ;;  %v323_v1 = vadd.f32 %v322_v13, %v321_v33  ;;  %v515_v29 = vadd.f32 %v514_v37, %v513_v34 }
  0xd5   :  { %3277 = vmatprep.subr.bf16.mxu0 %v3276_v15  ;;  %v956_v62 = vld [vmem:[%s5582_s1 + $0xd50] sm:$0xff]  ;;  %v945_v0 = vld [vmem:[%s5582_s1 + $0xcf8] sm:$0xff]  ;;  %v3312_v32 = vpack.c.bf16 %v973_v24, %v972_v58  ;;  %v974_v2 = vld [vmem:[%s5582_s1 + $0xde0] sm:$0xff]  ;;  %v294_v5 = vrot.slane %v293_v55, 1  ;;  %v304_v6 = vrot.slane %v303_v56, 2  ;;  %v496_v7 = vrot.slane %v495_v57, 2 }
  0xd6   :  { %3303 = vmatpush3.bf16.msra.mxu1 %v3302_v22  ;;  %v944_v63 = vld [vmem:[%s5582_s1 + $0xcf0] sm:$0xff]  ;;  %v957_v49 = vld [vmem:[%s5582_s1 + $0xd58] sm:$0xff]  ;;  %v975_v4 = vld [vmem:[%s5582_s1 + $0xde8] sm:$0xff]  ;;  %v3286_v8 = vpack.c.bf16 %v927_v53, %v926_v52  ;;  %v486_v11 = vrot.slane %v485_v25, 1  ;;  %v334_v14 = vrot.slane %v333_v27, 2  ;;  %v526_v15 = vrot.slane %v525_v59, 2 }
  0xd7   :  { %3305 = vmatprep.subr.bf16.mxu1 %v3304_v19  ;;  %v928_v9 = vld [vmem:[%s5582_s1 + $0xc70] sm:$0xff]  ;;  %v929_v10 = vld [vmem:[%s5582_s1 + $0xc78] sm:$0xff]  ;;  %v3288_v16 = vpack.c.bf16 %v945_v0, %v944_v63  ;;  %v3314_v17 = vpack.c.bf16 %v957_v49, %v956_v62  ;;  %v3316_v18 = vpack.c.bf16 %v975_v4, %v974_v2  ;;  %v994_v21 = vld [vmem:[%s5582_s1 + $0xe80] sm:$0xff]  ;;  %v324_v23 = vrot.slane %v323_v1, 1 }
  0xd8   :  { %3279 = vmatpush3.bf16.msra.mxu0 %v3278_v39  ;;  %v995_v22 = vld [vmem:[%s5582_s1 + $0xe88] sm:$0xff]  ;;  %v516_v26 = vrot.slane %v515_v29, 1  ;;  %v958_v28 = vld [vmem:[%s5582_s1 + $0xd60] sm:$0xff]  ;;  %v3290_v33 = vpack.c.bf16 %v929_v10, %v928_v9  ;;  %v295_v34 = vadd.f32 %v294_v5, %v293_v55  ;;  %v305_v19 = vadd.f32 %v304_v6, %v303_v56  ;;  %v976_v38 = vld [vmem:[%s5582_s1 + $0xdf0] sm:$0xff] }
  0xd9   :  { %3281 = vmatprep.subr.bf16.mxu0 %v3280_v45  ;;  %v497_v20 = vadd.f32 %v496_v7, %v495_v57  ;;  %v959_v30 = vld [vmem:[%s5582_s1 + $0xd68] sm:$0xff]  ;;  %v977_v31 = vld [vmem:[%s5582_s1 + $0xdf8] sm:$0xff]  ;;  %v487_v35 = vadd.f32 %v486_v11, %v485_v25  ;;  %v335_v36 = vadd.f32 %v334_v14, %v333_v27  ;;  %v527_v39 = vadd.f32 %v526_v15, %v525_v59  ;;  %v978_v41 = vld [vmem:[%s5582_s1 + $0xe00] sm:$0xff] }
  0xda   :  { %3307 = vmatpush3.bf16.msra.mxu1 %v3306_v46  ;;  %v3324_v40 = vpack.c.bf16 %v995_v22, %v994_v21  ;;  %v979_v42 = vld [vmem:[%s5582_s1 + $0xe08] sm:$0xff]  ;;  %v996_v43 = vld [vmem:[%s5582_s1 + $0xe90] sm:$0xff]  ;;  %v997_v44 = vld [vmem:[%s5582_s1 + $0xe98] sm:$0xff]  ;;  %v325_v45 = vadd.f32 %v324_v23, %v323_v1  ;;  %v517_v46 = vadd.f32 %v516_v26, %v515_v29  ;;  %v3320_v48 = vpack.c.bf16 %v977_v31, %v976_v38 }
  0xdb   :  { %3309 = vmatprep.subr.bf16.mxu1 %v3308_v47  ;;  %v3318_v47 = vpack.c.bf16 %v959_v30, %v958_v28  ;;  %v960_v12 = vld [vmem:[%s5582_s1 + $0xd70] sm:$0xff]  ;;  %v961_v13 = vld [vmem:[%s5582_s1 + $0xd78] sm:$0xff]  ;;  %v306_v37 = vrot.slane %v305_v19, 1  ;;  %v498_v50 = vrot.slane %v497_v20, 1  ;;  %v1139_v51 = vsel %vm1114_vm1, %v487_v35, %v295_v34  ;;  %v1026_v55 = vld [vmem:[%s5582_s1 + $0xf80] sm:$0xff] }
  0xdc   :  { %3283 = vmatpush3.bf16.msra.mxu0 %v3282_v54  ;;  %v3326_v54 = vpack.c.bf16 %v979_v42, %v978_v41  ;;  %v1027_v56 = vld [vmem:[%s5582_s1 + $0xf88] sm:$0xff]  ;;  %v336_v57 = vrot.slane %v335_v36, 1  ;;  %v528_v58 = vrot.slane %v527_v39, 1  ;;  %v3328_v24 = vpack.c.bf16 %v997_v44, %v996_v43  ;;  %v980_v25 = vld [vmem:[%s5582_s1 + $0xe10] sm:$0xff]  ;;  %v981_v27 = vld [vmem:[%s5582_s1 + $0xe18] sm:$0xff] }
  0xdd   :  { %3285 = vmatprep.subr.bf16.mxu0 %v3284_v60  ;;  %v998_v59 = vld [vmem:[%s5582_s1 + $0xea0] sm:$0xff]  ;;  %v3322_v60 = vpack.c.bf16 %v961_v13, %v960_v12  ;;  %v999_v52 = vld [vmem:[%s5582_s1 + $0xea8] sm:$0xff]  ;;  %v1144_v53 = vsel %vm1114_vm1, %v517_v46, %v325_v45  ;;  %v3356_v63 = vpack.c.bf16 %v1027_v56, %v1026_v55  ;;  %v307_v0 = vadd.f32 %v306_v37, %v305_v19  ;;  %v1028_v2 = vld [vmem:[%s5582_s1 + $0xf90] sm:$0xff] }
  0xde   :  { %3311 = vmatpush3.bf16.msra.mxu1 %v3310_v61  ;;  %v43_v61 = vld [vmem:[%s5581_s0 + $0xe0] sm:$0xff]  ;;  %v499_v1 = vadd.f32 %v498_v50, %v497_v20  ;;  %v3330_v49 = vpack.c.bf16 %v981_v27, %v980_v25  ;;  %v1029_v4 = vld [vmem:[%s5582_s1 + $0xf98] sm:$0xff]  ;;  %v337_v5 = vadd.f32 %v336_v57, %v335_v36  ;;  %v529_v6 = vadd.f32 %v528_v58, %v527_v39  ;;  %v983_v9 = vld [vmem:[%s5582_s1 + $0xe28] sm:$0xff] }
  0xdf   :  { %3313 = vmatprep.subr.bf16.mxu1 %v3312_v32  ;;  %v75_v62 = vld [vmem:[%s5581_s0 + $0x1e0] sm:$0xff]  ;;  %v1011_v32 = vld [vmem:[%s5582_s1 + $0xf08] sm:$0xff]  ;;  %v3332_v7 = vpack.c.bf16 %v999_v52, %v998_v59  ;;  %v110_v10 = vsel %vm81_vm0, %v43_v61, 0.0  ;;  %v1000_v14 = vld [vmem:[%s5582_s1 + $0xeb0] sm:$0xff] }
  0xe0   :  { %3287 = vmatpush3.bf16.msra.mxu0 %v3286_v8  ;;  %v1010_v29 = vld [vmem:[%s5582_s1 + $0xf00] sm:$0xff]  ;;  %v142_v11 = vsel %vm81_vm0, %v75_v62, 0.0  ;;  %v1001_v15 = vld [vmem:[%s5582_s1 + $0xeb8] sm:$0xff]  ;;  %v1012_v21 = vld [vmem:[%s5582_s1 + $0xf10] sm:$0xff]  ;;  %v314_v19 = vrot.slane %v110_v10, 4  ;;  %v1146_v30 = vsel %vm1114_vm1, %v529_v6, %v337_v5 }
  0xe1   :  { %3289 = vmatprep.subr.bf16.mxu0 %v3288_v16  ;;  %v982_v8 = vld [vmem:[%s5582_s1 + $0xe20] sm:$0xff]  ;;  %v1141_v16 = vsel %vm1114_vm1, %v499_v1, %v307_v0  ;;  %v1013_v22 = vld [vmem:[%s5582_s1 + $0xf18] sm:$0xff]  ;;  %v1031_v28 = vld [vmem:[%s5582_s1 + $0xfa8] sm:$0xff]  ;;  %v506_v20 = vrot.slane %v142_v11, 4  ;;  %v3336_v38 = vpack.c.bf16 %v1001_v15, %v1000_v14 }
  0xe2   :  { %3315 = vmatpush3.bf16.msra.mxu1 %v3314_v17  ;;  %v3358_v17 = vpack.c.bf16 %v1011_v32, %v1010_v29  ;;  %v1030_v23 = vld [vmem:[%s5582_s1 + $0xfa0] sm:$0xff]  ;;  %v3334_v26 = vpack.c.bf16 %v983_v9, %v982_v8  ;;  %v985_v34 = vld [vmem:[%s5582_s1 + $0xe38] sm:$0xff]  ;;  %v45_v31 = vld [vmem:[%s5581_s0 + $0xf0] sm:$0xff]  ;;  %v315_v46 = vadd.f32 %v314_v19, %v110_v10 }
  0xe3   :  { %3317 = vmatprep.subr.bf16.mxu1 %v3316_v18  ;;  %v3360_v18 = vpack.c.bf16 %v1029_v4, %v1028_v2  ;;  %v77_v35 = vld [vmem:[%s5581_s0 + $0x1f0] sm:$0xff]  ;;  %v1002_v36 = vld [vmem:[%s5582_s1 + $0xec0] sm:$0xff]  ;;  %v1003_v39 = vld [vmem:[%s5582_s1 + $0xec8] sm:$0xff]  ;;  %v3364_v41 = vpack.c.bf16 %v1031_v28, %v1030_v23 }
  0xe4   :  { %3291 = vmatpush3.bf16.msra.mxu0 %v3290_v33  ;;  %v984_v33 = vld [vmem:[%s5582_s1 + $0xe30] sm:$0xff]  ;;  %v1014_v43 = vld [vmem:[%s5582_s1 + $0xf20] sm:$0xff]  ;;  %v1015_v44 = vld [vmem:[%s5582_s1 + $0xf28] sm:$0xff]  ;;  %v144_v12 = vsel %vm81_vm0, %v77_v35, 0.0  ;;  %v3340_v37 = vpack.c.bf16 %v1003_v39, %v1002_v36 }
  0xe5   :  { %3325 = vmatprep.subr.bf16.mxu0 %v3324_v40  ;;  %v3362_v40 = vpack.c.bf16 %v1013_v22, %v1012_v21  ;;  %v3338_v42 = vpack.c.bf16 %v985_v34, %v984_v33  ;;  %v1032_v45 = vld [vmem:[%s5582_s1 + $0xfb0] sm:$0xff]  ;;  %v1033_v13 = vld [vmem:[%s5582_s1 + $0xfb8] sm:$0xff]  ;;  %v986_v50 = vld [vmem:[%s5582_s1 + $0xe40] sm:$0xff]  ;;  %v3366_v56 = vpack.c.bf16 %v1015_v44, %v1014_v43 }
  0xe6   :  { %3319 = vmatpush3.bf16.msra.mxu1 %v3318_v47  ;;  %v507_v47 = vadd.f32 %v506_v20, %v142_v11  ;;  %v1005_v55 = vld [vmem:[%s5582_s1 + $0xed8] sm:$0xff]  ;;  %v1016_v57 = vld [vmem:[%s5582_s1 + $0xf30] sm:$0xff]  ;;  %v3368_v25 = vpack.c.bf16 %v1033_v13, %v1032_v45  ;;  %v1035_v52 = vld [vmem:[%s5582_s1 + $0xfc8] sm:$0xff] }
  0xe7   :  { %2084 = vmatmul.mubr.f32.vlgmr.msra.gmra.mrb[12].mxu0 %v1139_v51  ;;  %3321 = vmatprep.subr.bf16.mxu1 %v3320_v48  ;;  %v112_v48 = vsel %vm81_vm0, %v45_v31, 0.0  ;;  %v987_v51 = vld [vmem:[%s5582_s1 + $0xe48] sm:$0xff]  ;;  %v1017_v27 = vld [vmem:[%s5582_s1 + $0xf38] sm:$0xff]  ;;  %v1042_v1 = vld [vmem:[%s5583_s2] sm:$0x1] }
  0xe8   :  { %3327 = vmatpush3.bf16.msra.mxu0 %v3326_v54  ;;  %2223 = vmatprep.mubr.f32.mxu0 %v1144_v53  ;;  %v1004_v54 = vld [vmem:[%s5582_s1 + $0xed0] sm:$0xff]  ;;  %v326_v58 = vrot.slane %v112_v48, 4  ;;  %v3342_v59 = vpack.c.bf16 %v987_v51, %v986_v50  ;;  %v316_v53 = vrot.slane %v315_v46, 2  ;;  %v508_v61 = vrot.slane %v507_v47, 2  ;;  %v989_v0 = vld [vmem:[%s5582_s1 + $0xe58] sm:$0xff]  ;;  %v1006_v29 = vld [vmem:[%s5582_s1 + $0xee0] sm:$0xff] }
  0xe9   :  { %3329 = vmatprep.subr.bf16.mxu0 %v3328_v24  ;;  %v518_v24 = vrot.slane %v144_v12, 4  ;;  %v3344_v62 = vpack.c.bf16 %v1005_v55, %v1004_v54  ;;  %v1007_v32 = vld [vmem:[%s5582_s1 + $0xee8] sm:$0xff]  ;;  %v1018_v4 = vld [vmem:[%s5582_s1 + $0xf40] sm:$0xff]  ;;  %v1036_v9 = vld [vmem:[%s5582_s1 + $0xfd0] sm:$0xff]  ;;  %v1043_v15 = vmul.f32 7.0, %v1042_v1 }
  0xea   :  { %3323 = vmatpush3.bf16.msra.mxu1 %v3322_v60  ;;  %v1034_v60 = vld [vmem:[%s5582_s1 + $0xfc0] sm:$0xff]  ;;  %v327_v5 = vadd.f32 %v326_v58, %v112_v48  ;;  %v1037_v10 = vld [vmem:[%s5582_s1 + $0xfd8] sm:$0xff]  ;;  %v317_v11 = vadd.f32 %v316_v53, %v315_v46  ;;  %v509_v14 = vadd.f32 %v508_v61, %v507_v47  ;;  %v991_v21 = vld [vmem:[%s5582_s1 + $0xe68] sm:$0xff] }
  0xeb   :  { %3357 = vmatprep.subr.bf16.mxu1 %v3356_v63  ;;  %v988_v63 = vld [vmem:[%s5582_s1 + $0xe50] sm:$0xff]  ;;  %v3372_v2 = vpack.c.bf16 %v1035_v52, %v1034_v60  ;;  %v519_v6 = vadd.f32 %v518_v24, %v144_v12  ;;  %v3376_v33 = vpack.c.bf16 %v1037_v10, %v1036_v9  ;;  %v1038_v35 = vld [vmem:[%s5582_s1 + $0xfe0] sm:$0xff]  ;;  %v1039_v36 = vld [vmem:[%s5582_s1 + $0xfe8] sm:$0xff] }
  0xec   :  { %3331 = vmatpush3.bf16.msra.mxu0 %v3330_v49  ;;  %v3370_v49 = vpack.c.bf16 %v1017_v27, %v1016_v57  ;;  %v3346_v8 = vpack.c.bf16 %v989_v0, %v988_v63  ;;  %v1008_v23 = vld [vmem:[%s5582_s1 + $0xef0] sm:$0xff]  ;;  %v328_v19 = vrot.slane %v327_v5, 2  ;;  %v318_v39 = vrot.slane %v317_v11, 1  ;;  %v993_v44 = vld [vmem:[%s5582_s1 + $0xe78] sm:$0xff]  ;;  %v1022_v12 = vld [vmem:[%s5582_s1 + $0xf60] sm:$0xff] }
  0xed   :  { %3333 = vmatprep.subr.bf16.mxu0 %v3332_v7  ;;  %2154 = vmatmul.mubr.f32.vlgmr.msra.gmra.mrb[12].mxu1 %v1141_v16  ;;  %v1019_v7 = vld [vmem:[%s5582_s1 + $0xf48] sm:$0xff]  ;;  %v1047_v16 = vsub.s32 0, %v3582_v3  ;;  %v1020_v34 = vld [vmem:[%s5582_s1 + $0xf50] sm:$0xff]  ;;  %v520_v20 = vrot.slane %v519_v6, 2  ;;  %v3380_v46 = vpack.c.bf16 %v1039_v36, %v1038_v35  ;;  %v1041_v57 = vld [vmem:[%s5582_s1 + $0xff8] sm:$0xff] }
  0xee   :  { %3359 = vmatpush3.bf16.msra.mxu1 %v3358_v17  ;;  %2293 = vmatprep.mubr.f32.mxu1 %v1146_v30  ;;  %v3348_v17 = vpack.c.bf16 %v1007_v32, %v1006_v29  ;;  %v3374_v3 = vpack.c.bf16 %v1019_v7, %v1018_v4  ;;  %v992_v43 = vld [vmem:[%s5582_s1 + $0xe70] sm:$0xff]  ;;  %v329_v47 = vadd.f32 %v328_v19, %v327_v5  ;;  %v1023_v13 = vld [vmem:[%s5582_s1 + $0xf68] sm:$0xff]  ;;  %v1025_v53 = vld [vmem:[%s5582_s1 + $0xf78] sm:$0xff] }
  0xef   :  { %3361 = vmatprep.subr.bf16.mxu1 %v3360_v18  ;;  %v990_v18 = vld [vmem:[%s5582_s1 + $0xe60] sm:$0xff]  ;;  %v521_v48 = vadd.f32 %v520_v20, %v519_v6  ;;  %v319_v50 = vadd.f32 %v318_v39, %v317_v11  ;;  %v1024_v52 = vld [vmem:[%s5582_s1 + $0xf70] sm:$0xff] }
  0xf0   :  { %3335 = vmatpush3.bf16.msra.mxu0 %v3334_v26  ;;  %v1009_v26 = vld [vmem:[%s5582_s1 + $0xef8] sm:$0xff]  ;;  %v3350_v31 = vpack.c.bf16 %v991_v21, %v990_v18  ;;  %v330_v27 = vrot.slane %v329_v47, 1  ;;  %v3386_v63 = vpack.c.bf16 %v1025_v53, %v1024_v52 }
  0xf1   :  { %3337 = vmatprep.subr.bf16.mxu0 %v3336_v38  ;;  %v1021_v38 = vld [vmem:[%s5582_s1 + $0xf58] sm:$0xff] }
  0xf2   :  { %3363 = vmatpush3.bf16.msra.mxu1 %v3362_v40  ;;  %v510_v40 = vrot.slane %v509_v14, 1  ;;  %v3378_v45 = vpack.c.bf16 %v1021_v38, %v1020_v34  ;;  %v331_v0 = vadd.f32 %v330_v27, %v329_v47 }
  0xf3   :  { %3365 = vmatprep.subr.bf16.mxu1 %v3364_v41  ;;  %v1048_v41 = vrot.slane %v1043_v15, %v1047_v16 }
  0xf4   :  { %3339 = vmatpush3.bf16.msra.mxu0 %v3338_v42  ;;  %v3352_v42 = vpack.c.bf16 %v1009_v26, %v1008_v23  ;;  %v511_v51 = vadd.f32 %v510_v40, %v509_v14 }
  0xf5   :  { %3341 = vmatprep.subr.bf16.mxu0 %v3340_v37  ;;  %v3354_v37 = vpack.c.bf16 %v993_v44, %v992_v43 }
  0xf6   :  { %3367 = vmatpush3.bf16.msra.mxu1 %v3366_v56  ;;  %v1040_v56 = vld [vmem:[%s5582_s1 + $0xff0] sm:$0xff]  ;;  %v1143_v61 = vsel %vm1114_vm1, %v511_v51, %v319_v50  ;;  %s3413_s1 = smov [#allocation2]  }
  0xf7   :  { %3369 = vmatprep.subr.bf16.mxu1 %v3368_v25  ;;  %v3382_v25 = vpack.c.bf16 %v1023_v13, %v1022_v12  ;;  %v3384_v60 = vpack.c.bf16 %v1041_v57, %v1040_v56  ;;  %s2308_s27 = sshll.u32 %s3413_s1, 4  ;;  %s2309_s27 = int_to_ptr.vmem [resolvable:$true] %s2308_s27 }
  0xf8   :  { %3343 = vmatpush3.bf16.msra.mxu0 %v3342_v59  ;;  %v522_v59 = vrot.slane %v521_v48, 1  ;;  %s3389_s28 = scalar_lea.vmem %s2309_s27, 32  ;;  %p3394_p1 = scmp.lt.s32.totalorder %s2309_s27, %s2309_s27 }
  0xf9   :  { %3345 = vmatprep.subr.bf16.mxu0 %v3344_v62  ;;  %p3390_p0 = scmp.ne.s32.totalorder %s2309_s27, %s3389_s28  ;;  %p3395_p2 = scmp.lt.s32.totalorder %s3389_s28, %s3389_s28 }
  0xfa   :  { %v2348_v22 = vpop.f32.mrb[0].mxu0  ;;  %3371 = vmatpush3.bf16.msra.mxu1 %v3370_v49  ;;  %v523_v1 = vadd.f32 %v522_v59, %v521_v48 }
  0xfb   :  { %v2349_v28 = vpop.f32.mrb[1].mxu0  ;;  %3373 = vmatprep.subr.bf16.mxu1 %v3372_v2  ;;  %p3396_p3 = por %p3395_p2, %p3394_p1 }
  0xfc   :  { %v2350_v30 = vadd.f32 %v2349_v28, %v2348_v22  ;;  %3347 = vmatpush3.bf16.msra.mxu0 %v3346_v8  ;;  %v1145_v29 = vsel %vm1114_vm1, %v523_v1, %v331_v0 }
  0xfd   :  { %3349 = vmatprep.subr.bf16.mxu0 %v3348_v17  ;;  %p3397_p4 = pnand %p3396_p3, %p3390_p0 }
  0xfe   :  { %3375 = vmatpush3.bf16.msra.mxu1 %v3374_v3  ;;  %v1246_v54 = vadd.f32 %v2350_v30, %v1048_v41 }
  0xff   :  { %3377 = vmatprep.subr.bf16.mxu1 %v3376_v33 }
 0x100   :  { %3351 = vmatpush3.bf16.msra.mxu0 %v3350_v31  ;;  %v2383_v55 = vpop.f32.mrb[0].mxu1 }
 0x101   :  { %3353 = vmatprep.subr.bf16.mxu0 %v3352_v42  ;;  %v2384_v58 = vpop.f32.mrb[1].mxu1 }
 0x102   :  { %v2385_v24 = vadd.f32 %v2384_v58, %v2383_v55  ;;  %3379 = vmatpush3.bf16.msra.mxu1 %v3378_v45 }
 0x103   :  { %3381 = vmatprep.subr.bf16.mxu1 %v3380_v46 }
 0x104   :  { %3355 = vmatpush3.bf16.msra.mxu0 %v3354_v37  ;;  %v1316_v62 = vadd.f32 %v2385_v24, %v1246_v54 }
 0x106   :  { %3383 = vmatpush3.bf16.msra.mxu1 %v3382_v25 }
 0x107   :  { %2224 = vmatmul.mubr.f32.vlgmr.msra.gmra.mrb[14].mxu0 %v1143_v61  ;;  %3385 = vmatprep.subr.bf16.mxu1 %v3384_v60 }
 0x10a   :  { %3387 = vmatpush3.bf16.msra.mxu1 %v3386_v63 }
 0x10d   :  { %2294 = vmatmul.mubr.f32.vlgmr.msra.gmra.mrb[14].mxu1 %v1145_v29 }
 0x11a   :  { %v2418_v32 = vpop.f32.mrb[2].mxu0 }
 0x11b   :  { %v2419_v49 = vpop.f32.mrb[3].mxu0 }
 0x11c   :  { %v2420_v2 = vadd.f32 %v2419_v49, %v2418_v32 }
 0x11e   :  { %v1386_v4 = vadd.f32 %v2420_v2, %v1316_v62 }
 0x120   :  { %v2453_v5 = vpop.f32.mrb[2].mxu1 }
 0x121   :  { %v2454_v6 = vpop.f32.mrb[3].mxu1 }
 0x122   :  { %v2455_v7 = vadd.f32 %v2454_v6, %v2453_v5 }
 0x124   :  { %v1456_v8 = vadd.f32 %v2455_v7, %v1386_v4 }
 0x13a   :  { %v2488_v9 = vpop.f32.mrb[4].mxu0 }
 0x13b   :  { %v2489_v10 = vpop.f32.mrb[5].mxu0 }
 0x13c   :  { %v2490_v11 = vadd.f32 %v2489_v10, %v2488_v9 }
 0x13e   :  { %v1526_v14 = vadd.f32 %v2490_v11, %v1456_v8 }
 0x140   :  { %v2523_v15 = vpop.f32.mrb[4].mxu1 }
 0x141   :  { %v2524_v16 = vpop.f32.mrb[5].mxu1 }
 0x142   :  { %v2525_v17 = vadd.f32 %v2524_v16, %v2523_v15 }
 0x144   :  { %v1596_v18 = vadd.f32 %v2525_v17, %v1526_v14 }
 0x15a   :  { %v2558_v21 = vpop.f32.mrb[6].mxu0 }
 0x15b   :  { %v2559_v22 = vpop.f32.mrb[7].mxu0 }
 0x15c   :  { %v2560_v23 = vadd.f32 %v2559_v22, %v2558_v21 }
 0x15e   :  { %v1666_v26 = vadd.f32 %v2560_v23, %v1596_v18 }
 0x160   :  { %v2593_v3 = vpop.f32.mrb[6].mxu1 }
 0x161   :  { %v2594_v28 = vpop.f32.mrb[7].mxu1 }
 0x162   :  { %v2595_v33 = vadd.f32 %v2594_v28, %v2593_v3 }
 0x164   :  { %v1736_v34 = vadd.f32 %v2595_v33, %v1666_v26 }
 0x17a   :  { %v2628_v19 = vpop.f32.mrb[8].mxu0 }
 0x17b   :  { %v2629_v20 = vpop.f32.mrb[9].mxu0 }
 0x17c   :  { %v2630_v30 = vadd.f32 %v2629_v20, %v2628_v19 }
 0x17e   :  { %v1806_v38 = vadd.f32 %v2630_v30, %v1736_v34 }
 0x180   :  { %v2663_v31 = vpop.f32.mrb[8].mxu1 }
 0x181   :  { %v2664_v35 = vpop.f32.mrb[9].mxu1 }
 0x182   :  { %v2665_v36 = vadd.f32 %v2664_v35, %v2663_v31 }
 0x184   :  { %v1876_v39 = vadd.f32 %v2665_v36, %v1806_v38 }
 0x19a   :  { %v2698_v40 = vpop.f32.mrb[10].mxu0 }
 0x19b   :  { %v2699_v41 = vpop.f32.mrb[11].mxu0 }
 0x19c   :  { %v2700_v42 = vadd.f32 %v2699_v41, %v2698_v40 }
 0x19e   :  { %v1946_v43 = vadd.f32 %v2700_v42, %v1876_v39 }
 0x1a0   :  { %v2733_v44 = vpop.f32.mrb[10].mxu1 }
 0x1a1   :  { %v2734_v45 = vpop.f32.mrb[11].mxu1 }
 0x1a2   :  { %v2735_v46 = vadd.f32 %v2734_v45, %v2733_v44 }
 0x1a4   :  { %v2016_v47 = vadd.f32 %v2735_v46, %v1946_v43 }
 0x1ba   :  { %v2768_v48 = vpop.f32.mrb[12].mxu0 }
 0x1bb   :  { %v2769_v12 = vpop.f32.mrb[13].mxu0 }
 0x1bc   :  { %v2770_v13 = vadd.f32 %v2769_v12, %v2768_v48 }
 0x1be   :  { %v2086_v37 = vadd.f32 %v2770_v13, %v2016_v47 }
 0x1c0   :  { %v2803_v50 = vpop.f32.mrb[12].mxu1 }
 0x1c1   :  { %v2804_v51 = vpop.f32.mrb[13].mxu1 }
 0x1c2   :  { %v2805_v54 = vadd.f32 %v2804_v51, %v2803_v50 }
 0x1c4   :  { %v2156_v55 = vadd.f32 %v2805_v54, %v2086_v37 }
 0x1da   :  { %v2838_v56 = vpop.f32.mrb[14].mxu0 }
 0x1db   :  { %v2839_v57 = vpop.f32.mrb[15].mxu0 }
 0x1dc   :  { %v2840_v58 = vadd.f32 %v2839_v57, %v2838_v56 }
 0x1de   :  { %v2226_v24 = vadd.f32 %v2840_v58, %v2156_v55 }
 0x1e0   :  { %v2873_v25 = vpop.f32.mrb[14].mxu1 }
 0x1e1   :  { %v2874_v27 = vpop.f32.mrb[15].mxu1 }
 0x1e2   :  { %v2875_v59 = vadd.f32 %v2874_v27, %v2873_v25 }
 0x1e4   :  { %v2296_v60 = vadd.f32 %v2875_v59, %v2226_v24 }
 0x1e6   :  { %v2299_v52 = vmul.f32 0.125, %v2296_v60 }
 0x1e8   :  { %2301 = vst.msk [vmem:[#allocation2] sm:$0x3] %vm2300_vm2, %v2299_v52 }
 0x1e9   :  { %3400 = shalt.err (!%p3397_p4)
}
 0x1ea   :  { %s3401_s4 = scalar_lea.hbm %s5584_s3, 32 }
 0x1eb   :  { %p3402_p5 = scmp.ne.s32.totalorder %s5584_s3, %s3401_s4  ;;  %p3405_p6 = scmp.lt.u32.totalorder %s3401_s4, %s5584_s3 }
 0x1ed   :  { %p3407_p7 = pnand %p3405_p6, %p3402_p5 }
 0x1ef   :  { %3410 = shalt.err (!%p3407_p7)
}
 0x1f0   :  { %2311 = dma.vmem_to_hbm [thread:$0]  %s2309_s27, 32, %s5584_s3, [#allocation3]  }
 0x1f1   :  { %3411 = dma.done.wait [#allocation3], 32  }
 0x1f2   :  { %3412 = vsyncadd [#allocation3], 4294967264 }
 0x1f3   :  { %2315 = vsyncpa [#allocation3], 1 }

</bundles_post_ra>
